<compile_context>
chip_gen: v5e
topology: v5e:2x2
jax: 0.10.0
libtpu: 0.0.40
codegen_flags: <defaults>
</compile_context>

<pallas_src>
import functools

import jax
import jax.numpy as jnp
import numpy as np
from jax.experimental import pallas as pl
from jax.experimental.pallas import tpu as pltpu


# ----------------------------------------------------------------------------
# Pallas kernel: fused (M, K) x (K, Cout) GEMM + folded-BN + ReLU epilogue.
# One MXU dot per grid step; weights / scale / shift are grid-invariant.
# ----------------------------------------------------------------------------
def _gemm_bn_relu_kernel(x_ref, w_ref, sc_ref, sh_ref, o_ref):
    acc = jnp.dot(x_ref[...], w_ref[...], preferred_element_type=jnp.float32)
    y = acc * sc_ref[...] + sh_ref[...]                     # folded BN (f32)
    o_ref[...] = jnp.maximum(y, 0.0).astype(o_ref.dtype)    # ReLU


def _choose_tm(m_all):
    """Pick an M tile: multiple of 8, <=512, and >=2 grid steps when possible."""
    tm = 512
    while tm > 8 and 2 * tm > m_all:
        tm //= 2
    return tm


# ----------------------------------------------------------------------------
# Conv + BN + ReLU wrapper (NHWC, bf16 activations)
# ----------------------------------------------------------------------------
def conv_bn_relu(x, p):
    """x: (B, H, W, Cin) bf16.  p: ks/stride/pad, GEMM-packed weight, folded BN."""
    k, s, pad = p["ks"], p["stride"], p["pad"]
    A = -(-k // s)                                 # ceil(k / s)
    assert s * A >= k                              # zero-tap invariant
    B, H, W, cin = x.shape
    Ho = (H + 2 * pad - k) // s + 1
    Wo = (W + 2 * pad - k) // s + 1
    Hs, Ws = Ho + A - 1, Wo + A - 1
    csd = s * s * cin
    cout = p["wg"].shape[-1]

    # Single zero-pad to exactly (s*Hs, s*Ws).  Extra rows/cols beyond the
    # original receptive field only ever multiply zeroed weight taps.
    pb, pr = s * Hs - H - pad, s * Ws - W - pad
    assert pb >= 0 and pr >= 0
    xp = jnp.pad(x, ((0, 0), (pad, pb), (pad, pr), (0, 0)))

    # space-to-depth: stride-s KxK conv -> stride-1 AxA conv on s*s*Cin chans.
    if s == 1:
        xsd = xp
    else:
        xsd = (xp.reshape(B, Hs, s, Ws, s, cin)
                 .transpose(0, 1, 3, 2, 4, 5)
                 .reshape(B, Hs, Ws, csd))
    xsd = xsd.astype(jnp.bfloat16)

    # Fold all A*A taps into the contraction dim: (B, Ho, Wo, A*A*csd).
    if A == 1:
        patches = xsd
    else:
        patches = jnp.concatenate(
            [xsd[:, a:a + Ho, b:b + Wo, :] for a in range(A) for b in range(A)],
            axis=-1)
    kdim = A * A * csd
    m_all = B * Ho * Wo
    pmat = patches.reshape(m_all, kdim)

    tm = _choose_tm(m_all)
    grid_m = -(-m_all // tm)
    m_pad = grid_m * tm
    if m_pad != m_all:
        pmat = jnp.pad(pmat, ((0, m_pad - m_all), (0, 0)))   # zero rows, sliced off

    cost = pl.CostEstimate(
        flops=2 * m_pad * kdim * cout,
        transcendentals=0,
        bytes_accessed=(m_pad * kdim * 2 + kdim * cout * 2
                        + m_pad * cout * 2 + 2 * 4 * cout))

    out = pl.pallas_call(
        _gemm_bn_relu_kernel,
        out_shape=jax.ShapeDtypeStruct((m_pad, cout), jnp.bfloat16),
        grid=(grid_m,),
        in_specs=[
            pl.BlockSpec((tm, kdim), lambda m: (m, 0)),       # activations tile
            pl.BlockSpec((kdim, cout), lambda m: (0, 0)),     # weights (resident)
            pl.BlockSpec((1, cout), lambda m: (0, 0)),        # BN scale (resident)
            pl.BlockSpec((1, cout), lambda m: (0, 0)),        # BN shift (resident)
        ],
        out_specs=pl.BlockSpec((tm, cout), lambda m: (m, 0)),
        compiler_params=pltpu.CompilerParams(
            dimension_semantics=("parallel",),
            vmem_limit_bytes=32 * 1024 * 1024,
        ),
        cost_estimate=cost,
    )(pmat, p["wg"], p["scale"], p["shift"])

    return out[:m_all].reshape(B, Ho, Wo, cout)


# ----------------------------------------------------------------------------
# Parameter construction (deterministic, matches PyTorch init semantics)
# ----------------------------------------------------------------------------
class KeyGen:
    def __init__(self, key):
        self.key = key

    def __call__(self):
        self.key, sub = jax.random.split(self.key)
        return sub


def _fold_bn(kg, c, eps=1e-5):
    gamma = 1.0 + 0.1 * jax.random.normal(kg(), (c,), jnp.float32)
    beta = 0.1 * jax.random.normal(kg(), (c,), jnp.float32)
    mean = 0.1 * jax.random.normal(kg(), (c,), jnp.float32)
    var = 1.0 + 0.1 * jnp.abs(jax.random.normal(kg(), (c,), jnp.float32))
    scale = gamma / jnp.sqrt(var + eps)
    shift = beta - mean * scale
    return scale.reshape(1, c), shift.reshape(1, c)


def _repack_weight(w, ks, stride):
    """(k, k, cin, cout) bf16 -> (A*A*s*s*cin, cout) bf16 GEMM weight.

    Group order (kernel-row a, kernel-col b) and channel order (row-phase,
    col-phase, cin) match the space-to-depth + tap-unfold layout of the
    activations; taps outside the original k x k window stay zero.
    """
    k, _, cin, cout = w.shape
    s = stride
    A = -(-k // s)
    w2 = jnp.zeros((A, A, s, s, cin, cout), jnp.float32)
    for i in range(k):
        for j in range(k):
            w2 = w2.at[i // s, j // s, i % s, j % s].set(w[i, j].astype(jnp.float32))
    return w2.reshape(A * A * s * s * cin, cout).astype(jnp.bfloat16)


def _make_conv(kg, cin, cout, ks, stride, pad):
    # kaiming_normal_(a=1): std = sqrt(2 / (1 + 1^2) / fan_in) = 1/sqrt(fan_in)
    fan_in = ks * ks * cin
    w = jax.random.normal(kg(), (ks, ks, cin, cout), jnp.float32) * (fan_in ** -0.5)
    w = w.astype(jnp.bfloat16)
    scale, shift = _fold_bn(kg, cout)
    return {
        "ks": ks, "stride": stride, "pad": pad,
        "w": w,                                   # (k,k,cin,cout) bf16 (reference path)
        "wg": _repack_weight(w, ks, stride),      # GEMM-packed for the Pallas kernel
        "scale": scale, "shift": shift,
    }


def make_params(seed):
    kg = KeyGen(jax.random.PRNGKey(seed))
    return {
        "conv1": _make_conv(kg, 3, 64, 7, 2, 3),
        "conv2": _make_conv(kg, 64, 64, 3, 2, 1),
        "conv3": _make_conv(kg, 64, 64, 3, 2, 1),
        "conv_out": _make_conv(kg, 64, 128, 1, 1, 0),
    }


# ----------------------------------------------------------------------------
# Forward passes
# ----------------------------------------------------------------------------
def spatial_path_forward(x_nchw, params):
    x = jnp.transpose(x_nchw, (0, 2, 3, 1)).astype(jnp.bfloat16)   # NCHW -> NHWC
    for name in ("conv1", "conv2", "conv3", "conv_out"):
        x = conv_bn_relu(x, params[name])
    return jnp.transpose(x, (0, 3, 1, 2)).astype(jnp.float32)      # NHWC -> NCHW


def spatial_path_reference(x_nchw, params):
    """Pure-JAX reference (same bf16 operand quantization as the kernel path)."""
    x = jnp.transpose(x_nchw, (0, 2, 3, 1)).astype(jnp.float32)
    for name in ("conv1", "conv2", "conv3", "conv_out"):
        p = params[name]
        xq = x.astype(jnp.bfloat16).astype(jnp.float32)
        y = jax.lax.conv_general_dilated(
            xq, p["w"].astype(jnp.float32),
            window_strides=(p["stride"], p["stride"]),
            padding=((p["pad"], p["pad"]), (p["pad"], p["pad"])),
            dimension_numbers=("NHWC", "HWIO", "NHWC"),
            precision=jax.lax.Precision.HIGHEST)
        y = jnp.maximum(y * p["scale"] + p["shift"], 0.0)
        x = y.astype(jnp.bfloat16).astype(jnp.float32)
    return jnp.transpose(x, (0, 3, 1, 2))


# ----------------------------------------------------------------------------
if __name__ == "__main__":
    B, H, W = 2, 32, 32   # small; H, W divisible by 8 (SpatialPath downsamples 8x)

    params = make_params(seed=0)
    x = jax.random.normal(jax.random.PRNGKey(0), (B, 3, H, W), jnp.float32)

    fwd = jax.jit(functools.partial(spatial_path_forward, params=params))
    out = fwd(x)
    jax.block_until_ready(out)

    assert out.shape == (B, 128, H // 8, W // 8), out.shape

    ref = spatial_path_reference(x, params)
    np.testing.assert_allclose(np.asarray(out), np.asarray(ref), rtol=5e-2, atol=5e-2)

    print("KERNEL_OK")
</pallas_src>

<mosaic_0001>
module attributes {stable_mosaic.version = 11 : i64} {
  func.func @_gemm_bn_relu_kernel(%arg0: i32, %arg1: memref<256x192xbf16, #tpu.memory_space<vmem>>, %arg2: memref<192x64xbf16, #tpu.memory_space<vmem>>, %arg3: memref<1x64xf32, #tpu.memory_space<vmem>>, %arg4: memref<1x64xf32, #tpu.memory_space<vmem>>, %arg5: memref<256x64xbf16, #tpu.memory_space<vmem>>) attributes {dimension_semantics = [#tpu.dimension_semantics<parallel>], iteration_bounds = array<i64: 2>, scalar_prefetch = 0 : i64, scratch_operands = 0 : i64, tpu.core_type = #tpu.core_type<tc>, window_params = [{transform_indices = @transform_0, window_bounds = array<i64: 256, 192>}, {pipeline_mode = #tpu.pipeline_mode<synchronous>, transform_indices = @transform_1, window_bounds = array<i64: 192, 64>}, {pipeline_mode = #tpu.pipeline_mode<synchronous>, transform_indices = @transform_2, window_bounds = array<i64: 1, 64>}, {pipeline_mode = #tpu.pipeline_mode<synchronous>, transform_indices = @transform_3, window_bounds = array<i64: 1, 64>}, {transform_indices = @transform_4, window_bounds = array<i64: 256, 64>}]} {
    %c0 = arith.constant 0 : index
    %c0_0 = arith.constant 0 : index
    %0 = vector.load %arg1[%c0, %c0_0] : memref<256x192xbf16, #tpu.memory_space<vmem>>, vector<256x192xbf16>
    %c0_1 = arith.constant 0 : index
    %c0_2 = arith.constant 0 : index
    %1 = vector.load %arg2[%c0_1, %c0_2] : memref<192x64xbf16, #tpu.memory_space<vmem>>, vector<192x64xbf16>
    %cst = arith.constant dense<0.000000e+00> : vector<256x64xf32>
    %2 = tpu.matmul %0, %1, %cst {dimension_numbers = #tpu.dot_dimension_numbers<[1], [0], [0], [1], [0, 0, 1, 1], [], []>} : vector<256x192xbf16>, vector<192x64xbf16>, vector<256x64xf32> -> vector<256x64xf32>
    %c0_3 = arith.constant 0 : index
    %c0_4 = arith.constant 0 : index
    %3 = vector.load %arg3[%c0_3, %c0_4] : memref<1x64xf32, #tpu.memory_space<vmem>>, vector<1x64xf32>
    %4 = vector.broadcast %3 : vector<1x64xf32> to vector<256x64xf32>
    %5 = arith.mulf %2, %4 : vector<256x64xf32>
    %c0_5 = arith.constant 0 : index
    %c0_6 = arith.constant 0 : index
    %6 = vector.load %arg4[%c0_5, %c0_6] : memref<1x64xf32, #tpu.memory_space<vmem>>, vector<1x64xf32>
    %7 = vector.broadcast %6 : vector<1x64xf32> to vector<256x64xf32>
    %8 = arith.addf %5, %7 : vector<256x64xf32>
    %cst_7 = arith.constant 0.000000e+00 : f32
    %9 = vector.broadcast %cst_7 : f32 to vector<256x64xf32>
    %10 = arith.maximumf %8, %9 : vector<256x64xf32>
    %11 = arith.truncf %10 : vector<256x64xf32> to vector<256x64xbf16>
    %c0_8 = arith.constant 0 : index
    %c0_9 = arith.constant 0 : index
    %12 = vector.load %arg5[%c0_8, %c0_9] : memref<256x64xbf16, #tpu.memory_space<vmem>>, vector<256x64xbf16>
    tpu.vector_store %arg5[%c0_8, %c0_9], %11 {strides = array<i32>} : memref<256x64xbf16, #tpu.memory_space<vmem>>, vector<256x64xbf16>,
    return
  }
  func.func @transform_0(%arg0: i32) -> (i32, i32) {
    %c0_i32 = arith.constant 0 : i32
    %c0_i32_0 = arith.constant 0 : i32
    return %arg0, %c0_i32 : i32, i32
  }
  func.func @transform_1(%arg0: i32) -> (i32, i32) {
    %c0_i32 = arith.constant 0 : i32
    %c0_i32_0 = arith.constant 0 : i32
    %c0_i32_1 = arith.constant 0 : i32
    return %c0_i32, %c0_i32_0 : i32, i32
  }
  func.func @transform_2(%arg0: i32) -> (i32, i32) {
    %c0_i32 = arith.constant 0 : i32
    %c0_i32_0 = arith.constant 0 : i32
    %c0_i32_1 = arith.constant 0 : i32
    return %c0_i32, %c0_i32_0 : i32, i32
  }
  func.func @transform_3(%arg0: i32) -> (i32, i32) {
    %c0_i32 = arith.constant 0 : i32
    %c0_i32_0 = arith.constant 0 : i32
    %c0_i32_1 = arith.constant 0 : i32
    return %c0_i32, %c0_i32_0 : i32, i32
  }
  func.func @transform_4(%arg0: i32) -> (i32, i32) {
    %c0_i32 = arith.constant 0 : i32
    %c0_i32_0 = arith.constant 0 : i32
    return %arg0, %c0_i32 : i32, i32
  }
}

module attributes {stable_mosaic.version = 11 : i64} {
  func.func @_gemm_bn_relu_kernel(%arg0: i32, %arg1: memref<64x1024xbf16, #tpu.memory_space<vmem>>, %arg2: memref<1024x64xbf16, #tpu.memory_space<vmem>>, %arg3: memref<1x64xf32, #tpu.memory_space<vmem>>, %arg4: memref<1x64xf32, #tpu.memory_space<vmem>>, %arg5: memref<64x64xbf16, #tpu.memory_space<vmem>>) attributes {dimension_semantics = [#tpu.dimension_semantics<parallel>], iteration_bounds = array<i64: 2>, scalar_prefetch = 0 : i64, scratch_operands = 0 : i64, tpu.core_type = #tpu.core_type<tc>, window_params = [{transform_indices = @transform_0, window_bounds = array<i64: 64, 1024>}, {pipeline_mode = #tpu.pipeline_mode<synchronous>, transform_indices = @transform_1, window_bounds = array<i64: 1024, 64>}, {pipeline_mode = #tpu.pipeline_mode<synchronous>, transform_indices = @transform_2, window_bounds = array<i64: 1, 64>}, {pipeline_mode = #tpu.pipeline_mode<synchronous>, transform_indices = @transform_3, window_bounds = array<i64: 1, 64>}, {transform_indices = @transform_4, window_bounds = array<i64: 64, 64>}]} {
    %c0 = arith.constant 0 : index
    %c0_0 = arith.constant 0 : index
    %0 = vector.load %arg1[%c0, %c0_0] : memref<64x1024xbf16, #tpu.memory_space<vmem>>, vector<64x1024xbf16>
    %c0_1 = arith.constant 0 : index
    %c0_2 = arith.constant 0 : index
    %1 = vector.load %arg2[%c0_1, %c0_2] : memref<1024x64xbf16, #tpu.memory_space<vmem>>, vector<1024x64xbf16>
    %cst = arith.constant dense<0.000000e+00> : vector<64x64xf32>
    %2 = tpu.matmul %0, %1, %cst {dimension_numbers = #tpu.dot_dimension_numbers<[1], [0], [0], [1], [0, 0, 1, 1], [], []>} : vector<64x1024xbf16>, vector<1024x64xbf16>, vector<64x64xf32> -> vector<64x64xf32>
    %c0_3 = arith.constant 0 : index
    %c0_4 = arith.constant 0 : index
    %3 = vector.load %arg3[%c0_3, %c0_4] : memref<1x64xf32, #tpu.memory_space<vmem>>, vector<1x64xf32>
    %4 = vector.broadcast %3 : vector<1x64xf32> to vector<64x64xf32>
    %5 = arith.mulf %2, %4 : vector<64x64xf32>
    %c0_5 = arith.constant 0 : index
    %c0_6 = arith.constant 0 : index
    %6 = vector.load %arg4[%c0_5, %c0_6] : memref<1x64xf32, #tpu.memory_space<vmem>>, vector<1x64xf32>
    %7 = vector.broadcast %6 : vector<1x64xf32> to vector<64x64xf32>
    %8 = arith.addf %5, %7 : vector<64x64xf32>
    %cst_7 = arith.constant 0.000000e+00 : f32
    %9 = vector.broadcast %cst_7 : f32 to vector<64x64xf32>
    %10 = arith.maximumf %8, %9 : vector<64x64xf32>
    %11 = arith.truncf %10 : vector<64x64xf32> to vector<64x64xbf16>
    %c0_8 = arith.constant 0 : index
    %c0_9 = arith.constant 0 : index
    %12 = vector.load %arg5[%c0_8, %c0_9] : memref<64x64xbf16, #tpu.memory_space<vmem>>, vector<64x64xbf16>
    tpu.vector_store %arg5[%c0_8, %c0_9], %11 {strides = array<i32>} : memref<64x64xbf16, #tpu.memory_space<vmem>>, vector<64x64xbf16>,
    return
  }
  func.func @transform_0(%arg0: i32) -> (i32, i32) {
    %c0_i32 = arith.constant 0 : i32
    %c0_i32_0 = arith.constant 0 : i32
    return %arg0, %c0_i32 : i32, i32
  }
  func.func @transform_1(%arg0: i32) -> (i32, i32) {
    %c0_i32 = arith.constant 0 : i32
    %c0_i32_0 = arith.constant 0 : i32
    %c0_i32_1 = arith.constant 0 : i32
    return %c0_i32, %c0_i32_0 : i32, i32
  }
  func.func @transform_2(%arg0: i32) -> (i32, i32) {
    %c0_i32 = arith.constant 0 : i32
    %c0_i32_0 = arith.constant 0 : i32
    %c0_i32_1 = arith.constant 0 : i32
    return %c0_i32, %c0_i32_0 : i32, i32
  }
  func.func @transform_3(%arg0: i32) -> (i32, i32) {
    %c0_i32 = arith.constant 0 : i32
    %c0_i32_0 = arith.constant 0 : i32
    %c0_i32_1 = arith.constant 0 : i32
    return %c0_i32, %c0_i32_0 : i32, i32
  }
  func.func @transform_4(%arg0: i32) -> (i32, i32) {
    %c0_i32 = arith.constant 0 : i32
    %c0_i32_0 = arith.constant 0 : i32
    return %arg0, %c0_i32 : i32, i32
  }
}

module attributes {stable_mosaic.version = 11 : i64} {
  func.func @_gemm_bn_relu_kernel(%arg0: i32, %arg1: memref<16x1024xbf16, #tpu.memory_space<vmem>>, %arg2: memref<1024x64xbf16, #tpu.memory_space<vmem>>, %arg3: memref<1x64xf32, #tpu.memory_space<vmem>>, %arg4: memref<1x64xf32, #tpu.memory_space<vmem>>, %arg5: memref<16x64xbf16, #tpu.memory_space<vmem>>) attributes {dimension_semantics = [#tpu.dimension_semantics<parallel>], iteration_bounds = array<i64: 2>, scalar_prefetch = 0 : i64, scratch_operands = 0 : i64, tpu.core_type = #tpu.core_type<tc>, window_params = [{transform_indices = @transform_0, window_bounds = array<i64: 16, 1024>}, {pipeline_mode = #tpu.pipeline_mode<synchronous>, transform_indices = @transform_1, window_bounds = array<i64: 1024, 64>}, {pipeline_mode = #tpu.pipeline_mode<synchronous>, transform_indices = @transform_2, window_bounds = array<i64: 1, 64>}, {pipeline_mode = #tpu.pipeline_mode<synchronous>, transform_indices = @transform_3, window_bounds = array<i64: 1, 64>}, {transform_indices = @transform_4, window_bounds = array<i64: 16, 64>}]} {
    %c0 = arith.constant 0 : index
    %c0_0 = arith.constant 0 : index
    %0 = vector.load %arg1[%c0, %c0_0] : memref<16x1024xbf16, #tpu.memory_space<vmem>>, vector<16x1024xbf16>
    %c0_1 = arith.constant 0 : index
    %c0_2 = arith.constant 0 : index
    %1 = vector.load %arg2[%c0_1, %c0_2] : memref<1024x64xbf16, #tpu.memory_space<vmem>>, vector<1024x64xbf16>
    %cst = arith.constant dense<0.000000e+00> : vector<16x64xf32>
    %2 = tpu.matmul %0, %1, %cst {dimension_numbers = #tpu.dot_dimension_numbers<[1], [0], [0], [1], [0, 0, 1, 1], [], []>} : vector<16x1024xbf16>, vector<1024x64xbf16>, vector<16x64xf32> -> vector<16x64xf32>
    %c0_3 = arith.constant 0 : index
    %c0_4 = arith.constant 0 : index
    %3 = vector.load %arg3[%c0_3, %c0_4] : memref<1x64xf32, #tpu.memory_space<vmem>>, vector<1x64xf32>
    %4 = vector.broadcast %3 : vector<1x64xf32> to vector<16x64xf32>
    %5 = arith.mulf %2, %4 : vector<16x64xf32>
    %c0_5 = arith.constant 0 : index
    %c0_6 = arith.constant 0 : index
    %6 = vector.load %arg4[%c0_5, %c0_6] : memref<1x64xf32, #tpu.memory_space<vmem>>, vector<1x64xf32>
    %7 = vector.broadcast %6 : vector<1x64xf32> to vector<16x64xf32>
    %8 = arith.addf %5, %7 : vector<16x64xf32>
    %cst_7 = arith.constant 0.000000e+00 : f32
    %9 = vector.broadcast %cst_7 : f32 to vector<16x64xf32>
    %10 = arith.maximumf %8, %9 : vector<16x64xf32>
    %11 = arith.truncf %10 : vector<16x64xf32> to vector<16x64xbf16>
    %c0_8 = arith.constant 0 : index
    %c0_9 = arith.constant 0 : index
    %12 = vector.load %arg5[%c0_8, %c0_9] : memref<16x64xbf16, #tpu.memory_space<vmem>>, vector<16x64xbf16>
    tpu.vector_store %arg5[%c0_8, %c0_9], %11 {strides = array<i32>} : memref<16x64xbf16, #tpu.memory_space<vmem>>, vector<16x64xbf16>,
    return
  }
  func.func @transform_0(%arg0: i32) -> (i32, i32) {
    %c0_i32 = arith.constant 0 : i32
    %c0_i32_0 = arith.constant 0 : i32
    return %arg0, %c0_i32 : i32, i32
  }
  func.func @transform_1(%arg0: i32) -> (i32, i32) {
    %c0_i32 = arith.constant 0 : i32
    %c0_i32_0 = arith.constant 0 : i32
    %c0_i32_1 = arith.constant 0 : i32
    return %c0_i32, %c0_i32_0 : i32, i32
  }
  func.func @transform_2(%arg0: i32) -> (i32, i32) {
    %c0_i32 = arith.constant 0 : i32
    %c0_i32_0 = arith.constant 0 : i32
    %c0_i32_1 = arith.constant 0 : i32
    return %c0_i32, %c0_i32_0 : i32, i32
  }
  func.func @transform_3(%arg0: i32) -> (i32, i32) {
    %c0_i32 = arith.constant 0 : i32
    %c0_i32_0 = arith.constant 0 : i32
    %c0_i32_1 = arith.constant 0 : i32
    return %c0_i32, %c0_i32_0 : i32, i32
  }
  func.func @transform_4(%arg0: i32) -> (i32, i32) {
    %c0_i32 = arith.constant 0 : i32
    %c0_i32_0 = arith.constant 0 : i32
    return %arg0, %c0_i32 : i32, i32
  }
}

module attributes {stable_mosaic.version = 11 : i64} {
  func.func @_gemm_bn_relu_kernel(%arg0: i32, %arg1: memref<16x64xbf16, #tpu.memory_space<vmem>>, %arg2: memref<64x128xbf16, #tpu.memory_space<vmem>>, %arg3: memref<1x128xf32, #tpu.memory_space<vmem>>, %arg4: memref<1x128xf32, #tpu.memory_space<vmem>>, %arg5: memref<16x128xbf16, #tpu.memory_space<vmem>>) attributes {dimension_semantics = [#tpu.dimension_semantics<parallel>], iteration_bounds = array<i64: 2>, scalar_prefetch = 0 : i64, scratch_operands = 0 : i64, tpu.core_type = #tpu.core_type<tc>, window_params = [{transform_indices = @transform_0, window_bounds = array<i64: 16, 64>}, {pipeline_mode = #tpu.pipeline_mode<synchronous>, transform_indices = @transform_1, window_bounds = array<i64: 64, 128>}, {pipeline_mode = #tpu.pipeline_mode<synchronous>, transform_indices = @transform_2, window_bounds = array<i64: 1, 128>}, {pipeline_mode = #tpu.pipeline_mode<synchronous>, transform_indices = @transform_3, window_bounds = array<i64: 1, 128>}, {transform_indices = @transform_4, window_bounds = array<i64: 16, 128>}]} {
    %c0 = arith.constant 0 : index
    %c0_0 = arith.constant 0 : index
    %0 = vector.load %arg1[%c0, %c0_0] : memref<16x64xbf16, #tpu.memory_space<vmem>>, vector<16x64xbf16>
    %c0_1 = arith.constant 0 : index
    %c0_2 = arith.constant 0 : index
    %1 = vector.load %arg2[%c0_1, %c0_2] : memref<64x128xbf16, #tpu.memory_space<vmem>>, vector<64x128xbf16>
    %cst = arith.constant dense<0.000000e+00> : vector<16x128xf32>
    %2 = tpu.matmul %0, %1, %cst {dimension_numbers = #tpu.dot_dimension_numbers<[1], [0], [0], [1], [0, 0, 1, 1], [], []>} : vector<16x64xbf16>, vector<64x128xbf16>, vector<16x128xf32> -> vector<16x128xf32>
    %c0_3 = arith.constant 0 : index
    %c0_4 = arith.constant 0 : index
    %3 = vector.load %arg3[%c0_3, %c0_4] : memref<1x128xf32, #tpu.memory_space<vmem>>, vector<1x128xf32>
    %4 = vector.broadcast %3 : vector<1x128xf32> to vector<16x128xf32>
    %5 = arith.mulf %2, %4 : vector<16x128xf32>
    %c0_5 = arith.constant 0 : index
    %c0_6 = arith.constant 0 : index
    %6 = vector.load %arg4[%c0_5, %c0_6] : memref<1x128xf32, #tpu.memory_space<vmem>>, vector<1x128xf32>
    %7 = vector.broadcast %6 : vector<1x128xf32> to vector<16x128xf32>
    %8 = arith.addf %5, %7 : vector<16x128xf32>
    %cst_7 = arith.constant 0.000000e+00 : f32
    %9 = vector.broadcast %cst_7 : f32 to vector<16x128xf32>
    %10 = arith.maximumf %8, %9 : vector<16x128xf32>
    %11 = arith.truncf %10 : vector<16x128xf32> to vector<16x128xbf16>
    %c0_8 = arith.constant 0 : index
    %c0_9 = arith.constant 0 : index
    %12 = vector.load %arg5[%c0_8, %c0_9] : memref<16x128xbf16, #tpu.memory_space<vmem>>, vector<16x128xbf16>
    tpu.vector_store %arg5[%c0_8, %c0_9], %11 {strides = array<i32>} : memref<16x128xbf16, #tpu.memory_space<vmem>>, vector<16x128xbf16>,
    return
  }
  func.func @transform_0(%arg0: i32) -> (i32, i32) {
    %c0_i32 = arith.constant 0 : i32
    %c0_i32_0 = arith.constant 0 : i32
    return %arg0, %c0_i32 : i32, i32
  }
  func.func @transform_1(%arg0: i32) -> (i32, i32) {
    %c0_i32 = arith.constant 0 : i32
    %c0_i32_0 = arith.constant 0 : i32
    %c0_i32_1 = arith.constant 0 : i32
    return %c0_i32, %c0_i32_0 : i32, i32
  }
  func.func @transform_2(%arg0: i32) -> (i32, i32) {
    %c0_i32 = arith.constant 0 : i32
    %c0_i32_0 = arith.constant 0 : i32
    %c0_i32_1 = arith.constant 0 : i32
    return %c0_i32, %c0_i32_0 : i32, i32
  }
  func.func @transform_3(%arg0: i32) -> (i32, i32) {
    %c0_i32 = arith.constant 0 : i32
    %c0_i32_0 = arith.constant 0 : i32
    %c0_i32_1 = arith.constant 0 : i32
    return %c0_i32, %c0_i32_0 : i32, i32
  }
  func.func @transform_4(%arg0: i32) -> (i32, i32) {
    %c0_i32 = arith.constant 0 : i32
    %c0_i32_0 = arith.constant 0 : i32
    return %arg0, %c0_i32 : i32, i32
  }
}

</mosaic_0001>

<bundles_post_ra>
// kernel: spatial_path_forward.4
= control target key start
LH: loop header
LB: loop body
LE: loop exit
PB: predicated region body
PF: predicated region fallthrough
CT: control target
= control target key end

     0   :  { %s1233_s15 = smov 0   ;;  %s1518_s0 = inlined_call_operand.vmem [shape: bf16[512,192], index: 0, kind: input, shape index: {}]   ;;  %s1519_s1 = inlined_call_operand.vmem [shape: bf16[192,64], index: 1, kind: input, shape index: {}]   ;;  %s1520_s2 = inlined_call_operand.vmem [shape: f32[1,64], index: 2, kind: input, shape index: {}]   ;;  %s1521_s3 = inlined_call_operand.vmem [shape: f32[1,64], index: 3, kind: input, shape index: {}]   ;;  %s1522_s4 = inlined_call_operand.vmem [shape: bf16[512,64], index: 4, kind: output, shape index: {}]  }
   0x1 LB: > { %s929_s16 = sadd.s32 4294967295, %s1206_s15   ;;  %p933_p0 = scmp.ge.s32.totalorder %s1206_s15, 1  ;;  %s1206_s15 = sphi %s1233_s15, %s14_s15  }
   0x2   : > { %p164_p1 = scmp.lt.s32.totalorder %s1206_s15, 3 }
   0x4   : > { %p165_p2 = pnand %p933_p0, %p164_p1 }
   0x5   : > { %s934_s21 = sshll.u32 (!%p165_p2), %s929_s16, 5 }
   0x6   : > { %168 = sbr.rel (%p165_p2) target bundleno = 307 (0x133), region = 36  ;;  %p192_p3 = scmp.lt.s32.totalorder (!%p165_p2), %s934_s21, 63 }
   0xb   : > { %v1173_v0 = vld [vmem:[%s1519_s1 + $0x38] sm:$0xff]  ;;  %v1172_v2 = vld [vmem:[%s1519_s1 + $0x30] sm:$0xff]  ;;  %s1524_s21 = smov (!%p192_p3, %s934_s21), 63  ;;  %v1171_v4 = vld [vmem:[%s1519_s1 + $0x28] sm:$0xff]  ;;  %vm477_vm0 = vcmask 523264   ;;  %vm840_vm1 = vcmask 519168  }
   0xc   : > { %v1177_v1 = vld [vmem:[%s1519_s1 + $0x58] sm:$0xff]  ;;  %526 = vmatpush.bf16.msra.mxu0 %v1173_v0  ;;  %1178 = vmatpush.bf16.msra.mxu2 %v1173_v0  ;;  %v1176_v3 = vld [vmem:[%s1519_s1 + $0x50] sm:$0xff]  ;;  %s1133_s26 = sshll.u32 %s1524_s21, 3  ;;  %v1175_v5 = vld [vmem:[%s1519_s1 + $0x48] sm:$0xff] }
   0xd   : > { %619 = vmatpush.bf16.msra.mxu1 %v1177_v1  ;;  %1186 = vmatpush.bf16.msra.mxu3 %v1177_v1  ;;  %s1265_s7 = scalar_lea.vmem %s1518_s0, %s1133_s26  ;;  %v1170_v6 = vld [vmem:[%s1519_s1 + $0x20] sm:$0xff]  ;;  %v1169_v13 = vld [vmem:[%s1519_s1 + $0x18] sm:$0xff]  ;;  %v1168_v15 = vld [vmem:[%s1519_s1 + $0x10] sm:$0xff]  ;;  %s938_s26 = sshll.u32 %s1524_s21, 2 }
   0xe   : > { %v1174_v7 = vld [vmem:[%s1519_s1 + $0x40] sm:$0xff]  ;;  %v943_v9 = vld [vmem:[%s1265_s7 + $0x8] sm:$0xf0]  ;;  %v1152_v10 = vld [vmem:[%s1265_s7 + $0x94] sm:$0xf]  ;;  %s1383_s29 = scalar_lea.vmem %s1522_s4, %s938_s26 }
   0xf   : > { %v1134_v8 = vld [vmem:[%s1265_s7 + $0x4] sm:$0xf]  ;;  %v1015_v11 = vld [vmem:[%s1265_s7 + $0x98] sm:$0xf0]  ;;  %v1167_v16 = vld [vmem:[%s1519_s1 + $0x8] sm:$0xff] }
  0x10   : > { %527 = vmatpush.bf16.msra.mxu0 %v1172_v2  ;;  %1179 = vmatpush.bf16.msra.mxu2 %v1172_v2  ;;  %v946_v12 = vor.u32 %v1134_v8, %v943_v9  ;;  %v1018_v14 = vor.u32 %v1152_v10, %v1015_v11  ;;  %v1166_v17 = vld [vmem:[%s1519_s1] sm:$0xff]  ;;  %v1135_v19 = vld [vmem:[%s1265_s7 + $0x4] sm:$0xf0]  ;;  %v1136_v22 = vld [vmem:[%s1265_s7 + $0x14] sm:$0xf] }
  0x11   : > { %620 = vmatpush.bf16.msra.mxu1 %v1176_v3  ;;  %1187 = vmatpush.bf16.msra.mxu3 %v1176_v3  ;;  %v941_v18 = vld [vmem:[%s1265_s7] sm:$0xf]  ;;  %v1151_v21 = vld [vmem:[%s1265_s7 + $0x84] sm:$0xf0]  ;;  %v951_v23 = vld [vmem:[%s1265_s7 + $0x18] sm:$0xf0] }
  0x12   : > { %v1005_v20 = vld [vmem:[%s1265_s7 + $0x80] sm:$0xf]  ;;  %v1154_v24 = vld [vmem:[%s1265_s7 + $0xa4] sm:$0xf]  ;;  %v1023_v25 = vld [vmem:[%s1265_s7 + $0xa8] sm:$0xf0]  ;;  %v942_v26 = vor.u32 %v1135_v19, %v941_v18  ;;  %v954_v28 = vor.u32 %v1136_v22, %v951_v23 }
  0x13   : > { %v1006_v27 = vor.u32 %v1151_v21, %v1005_v20  ;;  %v1026_v29 = vor.u32 %v1154_v24, %v1023_v25  ;;  %v949_v30 = vld [vmem:[%s1265_s7 + $0x10] sm:$0xf]  ;;  %v1137_v31 = vld [vmem:[%s1265_s7 + $0x14] sm:$0xf0]  ;;  %v1138_v34 = vld [vmem:[%s1265_s7 + $0x24] sm:$0xf] }
  0x14   : > { %528 = vmatpush.bf16.msra.mxu0 %v1171_v4  ;;  %1180 = vmatpush.bf16.msra.mxu2 %v1171_v4  ;;  %v1013_v32 = vld [vmem:[%s1265_s7 + $0x90] sm:$0xf]  ;;  %v1153_v33 = vld [vmem:[%s1265_s7 + $0x94] sm:$0xf0]  ;;  %v959_v35 = vld [vmem:[%s1265_s7 + $0x28] sm:$0xf0]  ;;  %v950_v38 = vor.u32 %v1137_v31, %v949_v30 }
  0x15   : > { %621 = vmatpush.bf16.msra.mxu1 %v1175_v5  ;;  %1188 = vmatpush.bf16.msra.mxu3 %v1175_v5  ;;  %v1156_v36 = vld [vmem:[%s1265_s7 + $0xb4] sm:$0xf]  ;;  %v1031_v37 = vld [vmem:[%s1265_s7 + $0xb8] sm:$0xf0]  ;;  %v1014_v39 = vor.u32 %v1153_v33, %v1013_v32  ;;  %v962_v40 = vor.u32 %v1138_v34, %v959_v35  ;;  %v957_v42 = vld [vmem:[%s1265_s7 + $0x20] sm:$0xf] }
  0x16   : > { %v1034_v41 = vor.u32 %v1156_v36, %v1031_v37  ;;  %v1139_v43 = vld [vmem:[%s1265_s7 + $0x24] sm:$0xf0]  ;;  %v1021_v44 = vld [vmem:[%s1265_s7 + $0xa0] sm:$0xf]  ;;  %v1140_v46 = vld [vmem:[%s1265_s7 + $0x34] sm:$0xf] }
  0x17   : > { %v1155_v45 = vld [vmem:[%s1265_s7 + $0xa4] sm:$0xf0]  ;;  %v967_v47 = vld [vmem:[%s1265_s7 + $0x38] sm:$0xf0]  ;;  %v1158_v48 = vld [vmem:[%s1265_s7 + $0xc4] sm:$0xf]  ;;  %v958_v50 = vor.u32 %v1139_v43, %v957_v42 }
  0x18   : > { %529 = vmatpush.bf16.msra.mxu0 %v1170_v6  ;;  %1181 = vmatpush.bf16.msra.mxu2 %v1170_v6  ;;  %v1039_v49 = vld [vmem:[%s1265_s7 + $0xc8] sm:$0xf0]  ;;  %v1022_v51 = vor.u32 %v1155_v45, %v1021_v44  ;;  %v970_v52 = vor.u32 %v1140_v46, %v967_v47  ;;  %v965_v54 = vld [vmem:[%s1265_s7 + $0x30] sm:$0xf]  ;;  %v1141_v55 = vld [vmem:[%s1265_s7 + $0x34] sm:$0xf0] }
  0x19   : > { %622 = vmatpush.bf16.msra.mxu1 %v1174_v7  ;;  %1189 = vmatpush.bf16.msra.mxu3 %v1174_v7  ;;  %v1042_v53 = vor.u32 %v1158_v48, %v1039_v49  ;;  %v1029_v56 = vld [vmem:[%s1265_s7 + $0xb0] sm:$0xf]  ;;  %v1157_v57 = vld [vmem:[%s1265_s7 + $0xb4] sm:$0xf0]  ;;  %v1142_v58 = vld [vmem:[%s1265_s7 + $0x44] sm:$0xf]  ;;  %v966_v62 = vor.u32 %v1141_v55, %v965_v54 }
  0x1a   : > { %v975_v59 = vld [vmem:[%s1265_s7 + $0x48] sm:$0xf0]  ;;  %v1160_v60 = vld [vmem:[%s1265_s7 + $0xd4] sm:$0xf]  ;;  %v1047_v61 = vld [vmem:[%s1265_s7 + $0xd8] sm:$0xf0]  ;;  %v1030_v63 = vor.u32 %v1157_v57, %v1029_v56 }
  0x1b   : > { %v978_v0 = vor.u32 %v1142_v58, %v975_v59  ;;  %v1050_v1 = vor.u32 %v1160_v60, %v1047_v61  ;;  %v973_v2 = vld [vmem:[%s1265_s7 + $0x40] sm:$0xf]  ;;  %v1143_v3 = vld [vmem:[%s1265_s7 + $0x44] sm:$0xf0]  ;;  %v1144_v6 = vld [vmem:[%s1265_s7 + $0x54] sm:$0xf] }
  0x1c   : > { %1115 = vmatmul.msk.bf16.vlgmr.msra.gmra.mxu1 %vm477_vm0, %v946_v12  ;;  %530 = vmatpush.bf16.msra.mxu0 %v1169_v13  ;;  %v1037_v4 = vld [vmem:[%s1265_s7 + $0xc0] sm:$0xf]  ;;  %v1159_v5 = vld [vmem:[%s1265_s7 + $0xc4] sm:$0xf0]  ;;  %v983_v7 = vld [vmem:[%s1265_s7 + $0x58] sm:$0xf0]  ;;  %v974_v10 = vor.u32 %v1143_v3, %v973_v2 }
  0x1d   : > { %1182 = vmatpush.bf16.msra.mxu2 %v1169_v13  ;;  %1124 = vmatmul.msk.bf16.vlgmr.msra.gmra.mxu3 %vm477_vm0, %v1018_v14  ;;  %v1162_v8 = vld [vmem:[%s1265_s7 + $0xe4] sm:$0xf]  ;;  %v1055_v9 = vld [vmem:[%s1265_s7 + $0xe8] sm:$0xf0]  ;;  %v1038_v11 = vor.u32 %v1159_v5, %v1037_v4  ;;  %v986_v12 = vor.u32 %v1144_v6, %v983_v7  ;;  %v981_v14 = vld [vmem:[%s1265_s7 + $0x50] sm:$0xf] }
  0x1e   : > { %v1058_v13 = vor.u32 %v1162_v8, %v1055_v9  ;;  %v1146_v18 = vld [vmem:[%s1265_s7 + $0x64] sm:$0xf]  ;;  %v991_v19 = vld [vmem:[%s1265_s7 + $0x68] sm:$0xf0]  ;;  %v1164_v20 = vld [vmem:[%s1265_s7 + $0xf4] sm:$0xf] }
  0x1f   : > { %v1063_v21 = vld [vmem:[%s1265_s7 + $0xf8] sm:$0xf0]  ;;  %v994_v24 = vor.u32 %v1146_v18, %v991_v19  ;;  %v1148_v30 = vld [vmem:[%s1265_s7 + $0x74] sm:$0xf]  ;;  %v997_v35 = vld [vmem:[%s1265_s7 + $0x70] sm:$0xf] }
  0x20   : > { %531 = vmatpush.bf16.msra.mxu0 %v1168_v15  ;;  %v1066_v25 = vor.u32 %v1164_v20, %v1063_v21  ;;  %v999_v31 = vld [vmem:[%s1265_s7 + $0x78] sm:$0xf0]  ;;  %v1149_v36 = vld [vmem:[%s1265_s7 + $0x74] sm:$0xf0]  ;;  %v1061_v37 = vld [vmem:[%s1265_s7 + $0xf0] sm:$0xf] }
  0x21   : > { %1183 = vmatpush.bf16.msra.mxu2 %v1168_v15  ;;  %v1145_v15 = vld [vmem:[%s1265_s7 + $0x54] sm:$0xf0]  ;;  %v1002_v34 = vor.u32 %v1148_v30, %v999_v31  ;;  %v1368_v47 = vld [vmem:[%s1520_s2] ss:$0 sm:$0xff] }
  0x22   : > { %v982_v22 = vor.u32 %v1145_v15, %v981_v14 }
  0x24   : > { %532 = vmatpush.bf16.msra.mxu0 %v1167_v16 }
  0x25   : > { %1184 = vmatpush.bf16.msra.mxu2 %v1167_v16  ;;  %v1045_v16 = vld [vmem:[%s1265_s7 + $0xd0] sm:$0xf] }
  0x28   : > { %533 = vmatpush.bf16.msra.mxu0 %v1166_v17 }
  0x29   : > { %1185 = vmatpush.bf16.msra.mxu2 %v1166_v17  ;;  %v1161_v17 = vld [vmem:[%s1265_s7 + $0xd4] sm:$0xf0] }
  0x2a   : > { %v1046_v23 = vor.u32 %v1161_v17, %v1045_v16 }
  0x2b   : > { %534 = vmatmul.bf16.vlgmr.msra.gmra.mxu0 %v942_v26  ;;  %v989_v26 = vld [vmem:[%s1265_s7 + $0x60] sm:$0xf] }
  0x2c   : > { %574 = vmatmul.bf16.vlgmr.msra.gmra.mxu2 %v1006_v27  ;;  %1116 = vmatmul.msk.bf16.gmra.mxu1 %vm477_vm0, %v954_v28  ;;  %v1147_v27 = vld [vmem:[%s1265_s7 + $0x64] sm:$0xf0]  ;;  %v1053_v28 = vld [vmem:[%s1265_s7 + $0xe0] sm:$0xf] }
  0x2d   : > { %1125 = vmatmul.msk.bf16.gmra.mxu3 %vm477_vm0, %v1026_v29  ;;  %v1163_v29 = vld [vmem:[%s1265_s7 + $0xe4] sm:$0xf0]  ;;  %v990_v32 = vor.u32 %v1147_v27, %v989_v26 }
  0x2e   : > { %v1054_v33 = vor.u32 %v1163_v29, %v1053_v28 }
  0x3b   : > { %539 = vmatmul.bf16.gmra.mxu0 %v950_v38  ;;  %v1165_v38 = vld [vmem:[%s1265_s7 + $0xf4] sm:$0xf0] }
  0x3c   : > { %579 = vmatmul.bf16.gmra.mxu2 %v1014_v39  ;;  %1117 = vmatmul.msk.bf16.gmra.mxu1 %vm477_vm0, %v962_v40  ;;  %v1150_v39 = vld [vmem:[%s1265_s7 + $0x84] sm:$0xf]  ;;  %v1007_v40 = vld [vmem:[%s1265_s7 + $0x88] sm:$0xf0]  ;;  %v1062_v42 = vor.u32 %v1165_v38, %v1061_v37 }
  0x3d   : > { %1126 = vmatmul.msk.bf16.gmra.mxu3 %vm477_vm0, %v1034_v41  ;;  %v998_v41 = vor.u32 %v1149_v36, %v997_v35  ;;  %v1010_v43 = vor.u32 %v1150_v39, %v1007_v40 }
  0x4b   : > { %544 = vmatmul.bf16.gmra.mxu0 %v958_v50  ;;  %v1373_v50 = vld [vmem:[%s1521_s3] ss:$0 sm:$0xff] }
  0x4c   : > { %584 = vmatmul.bf16.gmra.mxu2 %v1022_v51  ;;  %1118 = vmatmul.msk.bf16.gmra.mxu1 %vm477_vm0, %v970_v52 }
  0x4d   : > { %1127 = vmatmul.msk.bf16.gmra.mxu3 %vm477_vm0, %v1042_v53 }
  0x5b   : > { %549 = vmatmul.bf16.gmra.mxu0 %v966_v62 }
  0x5c   : > { %589 = vmatmul.bf16.gmra.mxu2 %v1030_v63  ;;  %1119 = vmatmul.msk.bf16.gmra.mxu1 %vm477_vm0, %v978_v0 }
  0x5d   : > { %1128 = vmatmul.msk.bf16.gmra.mxu3 %vm477_vm0, %v1050_v1 }
  0x6b   : > { %554 = vmatmul.bf16.gmra.mxu0 %v974_v10 }
  0x6c   : > { %594 = vmatmul.bf16.gmra.mxu2 %v1038_v11  ;;  %1120 = vmatmul.msk.bf16.gmra.mxu1 %vm477_vm0, %v986_v12 }
  0x6d   : > { %1129 = vmatmul.msk.bf16.gmra.mxu3 %vm477_vm0, %v1058_v13 }
  0x7b   : > { %559 = vmatmul.bf16.gmra.mxu0 %v982_v22 }
  0x7c   : > { %599 = vmatmul.bf16.gmra.mxu2 %v1046_v23  ;;  %1121 = vmatmul.msk.bf16.gmra.mxu1 %vm477_vm0, %v994_v24 }
  0x7d   : > { %1130 = vmatmul.msk.bf16.gmra.mxu3 %vm477_vm0, %v1066_v25 }
  0x8b   : > { %564 = vmatmul.bf16.gmra.mxu0 %v990_v32 }
  0x8c   : > { %604 = vmatmul.bf16.gmra.mxu2 %v1054_v33  ;;  %1122 = vmatmul.msk.bf16.gmra.mxu1 %vm477_vm0, %v1002_v34 }
  0x99   : > { %v624_v44 = vpop.f32.mrf.mxu1 }
  0x9b   : > { %569 = vmatmul.bf16.gmra.mxu0 %v998_v41 }
  0x9c   : > { %609 = vmatmul.bf16.gmra.mxu2 %v1062_v42  ;;  %1123 = vmatmul.msk.bf16.gmra.mxu1 %vm477_vm0, %v1010_v43 }
  0xa0   : > { %v669_v46 = vpop.f32.mrf.mxu3 }
  0xa1   : > { %v626_v45 = vpop.f32.mrf.mxu1 }
  0xa8   : > { %v535_v48 = vpop.f32.mrf.mxu0  ;;  %v671_v56 = vpop.f32.mrf.mxu3 }
  0xa9   : > { %v625_v49 = vadd.f32 %v624_v44, %v535_v48  ;;  %v629_v51 = vpop.f32.mrf.mxu1 }
  0xab   : > { %v708_v52 = vmul.f32 %v1368_v47, %v625_v49 }
  0xad   : > { %v744_v53 = vadd.f32 %v1373_v50, %v708_v52 }
  0xaf   : > { %v776_v54 = vmax.f32 %v744_v53, 0.0  ;;  %v1378_v55 = vpop.f32.mrf.mxu2 }
  0xb0   : > { %v537_v57 = vpop.f32.mrf.mxu0  ;;  %v674_v5 = vpop.f32.mrf.mxu3 }
  0xb1   : > { %v808_v58 = vpack.c.bf16 %v776_v54, %v776_v54  ;;  %v627_v59 = vadd.f32 %v626_v45, %v537_v57  ;;  %v631_v60 = vpop.f32.mrf.mxu1 }
  0xb3   : > { %841 = vst.msk [vmem:[%s1383_s29] sm:$0xf] %vm840_vm1, %v808_v58  ;;  %v709_v61 = vmul.f32 %v1368_v47, %v627_v59 }
  0xb5   : > { %v745_v62 = vadd.f32 %v1373_v50, %v709_v61 }
  0xb7   : > { %v777_v63 = vmax.f32 %v745_v62, 0.0  ;;  %v1389_v0 = vpop.f32.mrf.mxu2 }
  0xb8   : > { %v540_v1 = vpop.f32.mrf.mxu0  ;;  %v676_v17 = vpop.f32.mrf.mxu3 }
  0xb9   : > { %v809_v2 = vpack.c.bf16 %v777_v63, %v777_v63  ;;  %v630_v3 = vadd.f32 %v629_v51, %v540_v1  ;;  %v634_v4 = vpop.f32.mrf.mxu1 }
  0xbb   : > { %842 = vst.msk [vmem:[%s1383_s29 + $0x4] sm:$0xf] %vm840_vm1, %v809_v2  ;;  %v710_v6 = vmul.f32 %v1368_v47, %v630_v3 }
  0xbd   : > { %v746_v7 = vadd.f32 %v1373_v50, %v710_v6 }
  0xbf   : > { %v778_v8 = vmax.f32 %v746_v7, 0.0  ;;  %v580_v9 = vpop.f32.mrf.mxu2 }
  0xc0   : > { %v670_v10 = vadd.f32 %v669_v46, %v580_v9  ;;  %v542_v11 = vpop.f32.mrf.mxu0  ;;  %v679_v33 = vpop.f32.mrf.mxu3 }
  0xc1   : > { %v810_v12 = vpack.c.bf16 %v778_v8, %v778_v8  ;;  %v632_v13 = vadd.f32 %v631_v60, %v542_v11  ;;  %v636_v14 = vpop.f32.mrf.mxu1 }
  0xc2   : > { %v726_v15 = vmul.f32 %v1368_v47, %v670_v10 }
  0xc3   : > { %843 = vst.msk [vmem:[%s1383_s29 + $0x8] sm:$0xf] %vm840_vm1, %v810_v12  ;;  %v711_v16 = vmul.f32 %v1368_v47, %v632_v13 }
  0xc4   : > { %v762_v18 = vadd.f32 %v1373_v50, %v726_v15 }
  0xc5   : > { %v747_v19 = vadd.f32 %v1373_v50, %v711_v16 }
  0xc6   : > { %v794_v20 = vmax.f32 %v762_v18, 0.0 }
  0xc7   : > { %v779_v21 = vmax.f32 %v747_v19, 0.0  ;;  %v582_v22 = vpop.f32.mrf.mxu2 }
  0xc8   : > { %v826_v23 = vpack.c.bf16 %v794_v20, %v794_v20  ;;  %v672_v24 = vadd.f32 %v671_v56, %v582_v22  ;;  %v545_v25 = vpop.f32.mrf.mxu0  ;;  %v681_v52 = vpop.f32.mrf.mxu3 }
  0xc9   : > { %v811_v26 = vpack.c.bf16 %v779_v21, %v779_v21  ;;  %v635_v27 = vadd.f32 %v634_v4, %v545_v25  ;;  %v639_v28 = vpop.f32.mrf.mxu1 }
  0xca   : > { %859 = vst.msk [vmem:[%s1383_s29 + $0x48] sm:$0xf] %vm840_vm1, %v826_v23  ;;  %v727_v29 = vmul.f32 %v1368_v47, %v672_v24 }
  0xcb   : > { %844 = vst.msk [vmem:[%s1383_s29 + $0xc] sm:$0xf] %vm840_vm1, %v811_v26  ;;  %v712_v30 = vmul.f32 %v1368_v47, %v635_v27 }
  0xcc   : > { %v763_v31 = vadd.f32 %v1373_v50, %v727_v29 }
  0xcd   : > { %v748_v32 = vadd.f32 %v1373_v50, %v712_v30 }
  0xce   : > { %v795_v34 = vmax.f32 %v763_v31, 0.0 }
  0xcf   : > { %v780_v35 = vmax.f32 %v748_v32, 0.0  ;;  %v585_v36 = vpop.f32.mrf.mxu2 }
  0xd0   : > { %v827_v37 = vpack.c.bf16 %v795_v34, %v795_v34  ;;  %v675_v38 = vadd.f32 %v674_v5, %v585_v36  ;;  %v547_v39 = vpop.f32.mrf.mxu0  ;;  %v684_v10 = vpop.f32.mrf.mxu3 }
  0xd1   : > { %v812_v40 = vpack.c.bf16 %v780_v35, %v780_v35  ;;  %v637_v41 = vadd.f32 %v636_v14, %v547_v39  ;;  %v641_v42 = vpop.f32.mrf.mxu1 }
  0xd2   : > { %860 = vst.msk [vmem:[%s1383_s29 + $0x4c] sm:$0xf] %vm840_vm1, %v827_v37  ;;  %v728_v43 = vmul.f32 %v1368_v47, %v675_v38 }
  0xd3   : > { %845 = vst.msk [vmem:[%s1383_s29 + $0x10] sm:$0xf] %vm840_vm1, %v812_v40  ;;  %v713_v44 = vmul.f32 %v1368_v47, %v637_v41 }
  0xd4   : > { %v764_v45 = vadd.f32 %v1373_v50, %v728_v43 }
  0xd5   : > { %v749_v46 = vadd.f32 %v1373_v50, %v713_v44 }
  0xd6   : > { %v796_v48 = vmax.f32 %v764_v45, 0.0 }
  0xd7   : > { %v781_v49 = vmax.f32 %v749_v46, 0.0  ;;  %v587_v51 = vpop.f32.mrf.mxu2 }
  0xd8   : > { %v828_v53 = vpack.c.bf16 %v796_v48, %v796_v48  ;;  %v677_v54 = vadd.f32 %v676_v17, %v587_v51  ;;  %v550_v56 = vpop.f32.mrf.mxu0  ;;  %v686_v26 = vpop.f32.mrf.mxu3 }
  0xd9   : > { %v813_v57 = vpack.c.bf16 %v781_v49, %v781_v49  ;;  %v640_v58 = vadd.f32 %v639_v28, %v550_v56  ;;  %v644_v59 = vpop.f32.mrf.mxu1 }
  0xda   : > { %861 = vst.msk [vmem:[%s1383_s29 + $0x50] sm:$0xf] %vm840_vm1, %v828_v53  ;;  %v729_v60 = vmul.f32 %v1368_v47, %v677_v54 }
  0xdb   : > { %846 = vst.msk [vmem:[%s1383_s29 + $0x14] sm:$0xf] %vm840_vm1, %v813_v57  ;;  %v714_v61 = vmul.f32 %v1368_v47, %v640_v58 }
  0xdc   : > { %v765_v62 = vadd.f32 %v1373_v50, %v729_v60 }
  0xdd   : > { %v750_v63 = vadd.f32 %v1373_v50, %v714_v61 }
  0xde   : > { %v797_v1 = vmax.f32 %v765_v62, 0.0 }
  0xdf   : > { %v782_v2 = vmax.f32 %v750_v63, 0.0  ;;  %v590_v3 = vpop.f32.mrf.mxu2 }
  0xe0   : > { %v829_v4 = vpack.c.bf16 %v797_v1, %v797_v1  ;;  %v680_v5 = vadd.f32 %v679_v33, %v590_v3  ;;  %v552_v6 = vpop.f32.mrf.mxu0 }
  0xe1   : > { %v814_v7 = vpack.c.bf16 %v782_v2, %v782_v2  ;;  %v642_v8 = vadd.f32 %v641_v42, %v552_v6  ;;  %v646_v9 = vpop.f32.mrf.mxu1  ;;  %v689_v42 = vpop.f32.mrf.mxu3 }
  0xe2   : > { %862 = vst.msk [vmem:[%s1383_s29 + $0x54] sm:$0xf] %vm840_vm1, %v829_v4  ;;  %v730_v11 = vmul.f32 %v1368_v47, %v680_v5 }
  0xe3   : > { %847 = vst.msk [vmem:[%s1383_s29 + $0x18] sm:$0xf] %vm840_vm1, %v814_v7  ;;  %v715_v12 = vmul.f32 %v1368_v47, %v642_v8 }
  0xe4   : > { %v766_v13 = vadd.f32 %v1373_v50, %v730_v11 }
  0xe5   : > { %v751_v14 = vadd.f32 %v1373_v50, %v715_v12 }
  0xe6   : > { %v798_v15 = vmax.f32 %v766_v13, 0.0 }
  0xe7   : > { %v783_v16 = vmax.f32 %v751_v14, 0.0  ;;  %v592_v17 = vpop.f32.mrf.mxu2 }
  0xe8   : > { %v830_v18 = vpack.c.bf16 %v798_v15, %v798_v15  ;;  %v682_v19 = vadd.f32 %v681_v52, %v592_v17  ;;  %v555_v20 = vpop.f32.mrf.mxu0 }
  0xe9   : > { %v815_v21 = vpack.c.bf16 %v783_v16, %v783_v16  ;;  %v645_v22 = vadd.f32 %v644_v59, %v555_v20  ;;  %v649_v23 = vpop.f32.mrf.mxu1  ;;  %v691_v62 = vpop.f32.mrf.mxu3 }
  0xea   : > { %863 = vst.msk [vmem:[%s1383_s29 + $0x58] sm:$0xf] %vm840_vm1, %v830_v18  ;;  %v731_v24 = vmul.f32 %v1368_v47, %v682_v19 }
  0xeb   : > { %848 = vst.msk [vmem:[%s1383_s29 + $0x1c] sm:$0xf] %vm840_vm1, %v815_v21  ;;  %v716_v25 = vmul.f32 %v1368_v47, %v645_v22 }
  0xec   : > { %v767_v27 = vadd.f32 %v1373_v50, %v731_v24 }
  0xed   : > { %v752_v28 = vadd.f32 %v1373_v50, %v716_v25 }
  0xee   : > { %v799_v29 = vmax.f32 %v767_v27, 0.0 }
  0xef   : > { %v784_v30 = vmax.f32 %v752_v28, 0.0  ;;  %v595_v31 = vpop.f32.mrf.mxu2 }
  0xf0   : > { %v831_v32 = vpack.c.bf16 %v799_v29, %v799_v29  ;;  %v685_v33 = vadd.f32 %v684_v10, %v595_v31  ;;  %v557_v34 = vpop.f32.mrf.mxu0 }
  0xf1   : > { %v816_v35 = vpack.c.bf16 %v784_v30, %v784_v30  ;;  %v647_v36 = vadd.f32 %v646_v9, %v557_v34  ;;  %v651_v37 = vpop.f32.mrf.mxu1  ;;  %v694_v17 = vpop.f32.mrf.mxu3 }
  0xf2   : > { %864 = vst.msk [vmem:[%s1383_s29 + $0x5c] sm:$0xf] %vm840_vm1, %v831_v32  ;;  %v732_v38 = vmul.f32 %v1368_v47, %v685_v33 }
  0xf3   : > { %849 = vst.msk [vmem:[%s1383_s29 + $0x20] sm:$0xf] %vm840_vm1, %v816_v35  ;;  %v717_v39 = vmul.f32 %v1368_v47, %v647_v36 }
  0xf4   : > { %v768_v40 = vadd.f32 %v1373_v50, %v732_v38 }
  0xf5   : > { %v753_v41 = vadd.f32 %v1373_v50, %v717_v39 }
  0xf6   : > { %v800_v43 = vmax.f32 %v768_v40, 0.0 }
  0xf7   : > { %v785_v44 = vmax.f32 %v753_v41, 0.0  ;;  %v597_v45 = vpop.f32.mrf.mxu2 }
  0xf8   : > { %v832_v46 = vpack.c.bf16 %v800_v43, %v800_v43  ;;  %v687_v48 = vadd.f32 %v686_v26, %v597_v45  ;;  %v560_v49 = vpop.f32.mrf.mxu0 }
  0xf9   : > { %v817_v51 = vpack.c.bf16 %v785_v44, %v785_v44  ;;  %v650_v52 = vadd.f32 %v649_v23, %v560_v49  ;;  %v654_v53 = vpop.f32.mrf.mxu1  ;;  %v696_v34 = vpop.f32.mrf.mxu3 }
  0xfa   : > { %865 = vst.msk [vmem:[%s1383_s29 + $0x60] sm:$0xf] %vm840_vm1, %v832_v46  ;;  %v733_v54 = vmul.f32 %v1368_v47, %v687_v48 }
  0xfb   : > { %850 = vst.msk [vmem:[%s1383_s29 + $0x24] sm:$0xf] %vm840_vm1, %v817_v51  ;;  %v718_v56 = vmul.f32 %v1368_v47, %v650_v52 }
  0xfc   : > { %v769_v57 = vadd.f32 %v1373_v50, %v733_v54 }
  0xfd   : > { %v754_v58 = vadd.f32 %v1373_v50, %v718_v56 }
  0xfe   : > { %v801_v59 = vmax.f32 %v769_v57, 0.0 }
  0xff   : > { %v786_v60 = vmax.f32 %v754_v58, 0.0  ;;  %v600_v61 = vpop.f32.mrf.mxu2 }
 0x100   : > { %v833_v63 = vpack.c.bf16 %v801_v59, %v801_v59  ;;  %v690_v1 = vadd.f32 %v689_v42, %v600_v61  ;;  %v562_v2 = vpop.f32.mrf.mxu0 }
 0x101   : > { %v818_v3 = vpack.c.bf16 %v786_v60, %v786_v60  ;;  %v652_v4 = vadd.f32 %v651_v37, %v562_v2  ;;  %v656_v5 = vpop.f32.mrf.mxu1  ;;  %v699_v54 = vpop.f32.mrf.mxu3 }
 0x102   : > { %866 = vst.msk [vmem:[%s1383_s29 + $0x64] sm:$0xf] %vm840_vm1, %v833_v63  ;;  %v734_v6 = vmul.f32 %v1368_v47, %v690_v1 }
 0x103   : > { %851 = vst.msk [vmem:[%s1383_s29 + $0x28] sm:$0xf] %vm840_vm1, %v818_v3  ;;  %v719_v7 = vmul.f32 %v1368_v47, %v652_v4 }
 0x104   : > { %v770_v8 = vadd.f32 %v1373_v50, %v734_v6 }
 0x105   : > { %v755_v9 = vadd.f32 %v1373_v50, %v719_v7 }
 0x106   : > { %v802_v10 = vmax.f32 %v770_v8, 0.0 }
 0x107   : > { %v787_v11 = vmax.f32 %v755_v9, 0.0  ;;  %v602_v12 = vpop.f32.mrf.mxu2 }
 0x108   : > { %v834_v13 = vpack.c.bf16 %v802_v10, %v802_v10  ;;  %v692_v14 = vadd.f32 %v691_v62, %v602_v12  ;;  %v565_v15 = vpop.f32.mrf.mxu0 }
 0x109   : > { %v819_v16 = vpack.c.bf16 %v787_v11, %v787_v11  ;;  %v655_v18 = vadd.f32 %v654_v53, %v565_v15  ;;  %v659_v19 = vpop.f32.mrf.mxu1 }
 0x10a   : > { %867 = vst.msk [vmem:[%s1383_s29 + $0x68] sm:$0xf] %vm840_vm1, %v834_v13  ;;  %v735_v20 = vmul.f32 %v1368_v47, %v692_v14 }
 0x10b   : > { %852 = vst.msk [vmem:[%s1383_s29 + $0x2c] sm:$0xf] %vm840_vm1, %v819_v16  ;;  %v720_v21 = vmul.f32 %v1368_v47, %v655_v18 }
 0x10c   : > { %v771_v22 = vadd.f32 %v1373_v50, %v735_v20 }
 0x10d   : > { %v756_v23 = vadd.f32 %v1373_v50, %v720_v21 }
 0x10e   : > { %v803_v24 = vmax.f32 %v771_v22, 0.0 }
 0x10f   : > { %v788_v25 = vmax.f32 %v756_v23, 0.0  ;;  %v605_v26 = vpop.f32.mrf.mxu2 }
 0x110   : > { %v835_v27 = vpack.c.bf16 %v803_v24, %v803_v24  ;;  %v695_v28 = vadd.f32 %v694_v17, %v605_v26  ;;  %v567_v29 = vpop.f32.mrf.mxu0 }
 0x111   : > { %v820_v30 = vpack.c.bf16 %v788_v25, %v788_v25  ;;  %v657_v31 = vadd.f32 %v656_v5, %v567_v29  ;;  %v661_v32 = vpop.f32.mrf.mxu1 }
 0x112   : > { %868 = vst.msk [vmem:[%s1383_s29 + $0x6c] sm:$0xf] %vm840_vm1, %v835_v27  ;;  %v736_v33 = vmul.f32 %v1368_v47, %v695_v28 }
 0x113   : > { %853 = vst.msk [vmem:[%s1383_s29 + $0x30] sm:$0xf] %vm840_vm1, %v820_v30  ;;  %v721_v35 = vmul.f32 %v1368_v47, %v657_v31 }
 0x114   : > { %v772_v36 = vadd.f32 %v1373_v50, %v736_v33 }
 0x115   : > { %v757_v37 = vadd.f32 %v1373_v50, %v721_v35 }
 0x116   : > { %v804_v38 = vmax.f32 %v772_v36, 0.0 }
 0x117   : > { %v789_v39 = vmax.f32 %v757_v37, 0.0  ;;  %v607_v40 = vpop.f32.mrf.mxu2 }
 0x118   : > { %v836_v41 = vpack.c.bf16 %v804_v38, %v804_v38  ;;  %v697_v42 = vadd.f32 %v696_v34, %v607_v40  ;;  %v570_v43 = vpop.f32.mrf.mxu0 }
 0x119   : > { %v821_v44 = vpack.c.bf16 %v789_v39, %v789_v39  ;;  %v660_v45 = vadd.f32 %v659_v19, %v570_v43  ;;  %v664_v46 = vpop.f32.mrf.mxu1 }
 0x11a   : > { %869 = vst.msk [vmem:[%s1383_s29 + $0x70] sm:$0xf] %vm840_vm1, %v836_v41  ;;  %v737_v48 = vmul.f32 %v1368_v47, %v697_v42  ;;  %v665_v49 = vadd.f32 %v664_v46, %v1378_v55 }
 0x11b   : > { %854 = vst.msk [vmem:[%s1383_s29 + $0x34] sm:$0xf] %vm840_vm1, %v821_v44  ;;  %v722_v51 = vmul.f32 %v1368_v47, %v660_v45 }
 0x11c   : > { %v773_v52 = vadd.f32 %v1373_v50, %v737_v48  ;;  %v724_v53 = vmul.f32 %v1368_v47, %v665_v49 }
 0x11d   : > { %v758_v56 = vadd.f32 %v1373_v50, %v722_v51 }
 0x11e   : > { %v805_v57 = vmax.f32 %v773_v52, 0.0  ;;  %v760_v58 = vadd.f32 %v1373_v50, %v724_v53 }
 0x11f   : > { %v790_v59 = vmax.f32 %v758_v56, 0.0  ;;  %v610_v60 = vpop.f32.mrf.mxu2 }
 0x120   : > { %v837_v55 = vpack.c.bf16 %v805_v57, %v805_v57  ;;  %v792_v61 = vmax.f32 %v760_v58, 0.0  ;;  %v700_v62 = vadd.f32 %v699_v54, %v610_v60  ;;  %v572_v63 = vpop.f32.mrf.mxu0 }
 0x121   : > { %v822_v1 = vpack.c.bf16 %v790_v59, %v790_v59  ;;  %v662_v2 = vadd.f32 %v661_v32, %v572_v63  ;;  %v666_v3 = vpop.f32.mrf.mxu1 }
 0x122   : > { %870 = vst.msk [vmem:[%s1383_s29 + $0x74] sm:$0xf] %vm840_vm1, %v837_v55  ;;  %v824_v4 = vpack.c.bf16 %v792_v61, %v792_v61  ;;  %v738_v5 = vmul.f32 %v1368_v47, %v700_v62  ;;  %v667_v6 = vadd.f32 %v666_v3, %v1389_v0  ;;  %v701_v0 = vpop.f32.mrf.mxu3 }
 0x123   : > { %855 = vst.msk [vmem:[%s1383_s29 + $0x38] sm:$0xf] %vm840_vm1, %v822_v1  ;;  %v723_v7 = vmul.f32 %v1368_v47, %v662_v2 }
 0x124   : > { %857 = vst.msk [vmem:[%s1383_s29 + $0x40] sm:$0xf] %vm840_vm1, %v824_v4  ;;  %v774_v8 = vadd.f32 %v1373_v50, %v738_v5  ;;  %v725_v9 = vmul.f32 %v1368_v47, %v667_v6 }
 0x125   : > { %v759_v10 = vadd.f32 %v1373_v50, %v723_v7 }
 0x126   : > { %v806_v11 = vmax.f32 %v774_v8, 0.0  ;;  %v761_v12 = vadd.f32 %v1373_v50, %v725_v9 }
 0x127   : > { %v791_v13 = vmax.f32 %v759_v10, 0.0  ;;  %v612_v14 = vpop.f32.mrf.mxu2 }
 0x128   : > { %v838_v15 = vpack.c.bf16 %v806_v11, %v806_v11  ;;  %v793_v16 = vmax.f32 %v761_v12, 0.0  ;;  %v702_v17 = vadd.f32 %v701_v0, %v612_v14 }
 0x129   : > { %v823_v18 = vpack.c.bf16 %v791_v13, %v791_v13 }
 0x12a   : > { %871 = vst.msk [vmem:[%s1383_s29 + $0x78] sm:$0xf] %vm840_vm1, %v838_v15  ;;  %v825_v19 = vpack.c.bf16 %v793_v16, %v793_v16  ;;  %v739_v20 = vmul.f32 %v1368_v47, %v702_v17 }
 0x12b   : > { %856 = vst.msk [vmem:[%s1383_s29 + $0x3c] sm:$0xf] %vm840_vm1, %v823_v18 }
 0x12c   : > { %858 = vst.msk [vmem:[%s1383_s29 + $0x44] sm:$0xf] %vm840_vm1, %v825_v19  ;;  %v775_v21 = vadd.f32 %v1373_v50, %v739_v20 }
 0x12e   : > { %v807_v22 = vmax.f32 %v775_v21, 0.0 }
 0x130   : > { %v839_v23 = vpack.c.bf16 %v807_v22, %v807_v22 }
 0x132   : > { %872 = vst.msk [vmem:[%s1383_s29 + $0x7c] sm:$0xf] %vm840_vm1, %v839_v23 }
 0x133 PF: > { %s14_s15 = sadd.s32 1, %s1206_s15  }
 0x134   : > { %p11_p4 = scmp.ge.s32.totalorder %s14_s15, 4  }
 0x136   :  { %13 = sbr.rel (!%p11_p4) target bundleno = 1 (0x1), region = 66 }

// kernel: spatial_path_forward.5
= control target key start
LH: loop header
LB: loop body
LE: loop exit
PB: predicated region body
PF: predicated region fallthrough
CT: control target
= control target key end

     0   :  { %s1781_s15 = smov 0   ;;  %s2152_s0 = inlined_call_operand.vmem [shape: bf16[128,1024], index: 0, kind: input, shape index: {}]   ;;  %s2153_s1 = inlined_call_operand.vmem [shape: bf16[1024,64], index: 1, kind: input, shape index: {}]   ;;  %s2154_s2 = inlined_call_operand.vmem [shape: f32[1,64], index: 2, kind: input, shape index: {}]   ;;  %s2155_s3 = inlined_call_operand.vmem [shape: f32[1,64], index: 3, kind: input, shape index: {}]   ;;  %s2156_s4 = inlined_call_operand.vmem [shape: bf16[128,64], index: 4, kind: output, shape index: {}]  }
   0x1 LB: > { %s1245_s16 = sadd.s32 4294967295, %s1754_s15   ;;  %p1249_p0 = scmp.ge.s32.totalorder %s1754_s15, 1  ;;  %s1754_s15 = sphi %s1781_s15, %s14_s15  }
   0x2   : > { %p164_p1 = scmp.lt.s32.totalorder %s1754_s15, 3 }
   0x4   : > { %p165_p2 = pnand %p1249_p0, %p164_p1 }
   0x5   : > { %s1250_s17 = sshll.u32 (!%p165_p2), %s1245_s16, 3 }
   0x6   : > { %168 = sbr.rel (%p165_p2) target bundleno = 310 (0x136), region = 36  ;;  %p192_p3 = scmp.lt.s32.totalorder (!%p165_p2), %s1250_s17, 15 }
   0xb   : > { %v1681_v0 = vld [vmem:[%s2153_s1 + $0x38] sm:$0xff]  ;;  %v1680_v4 = vld [vmem:[%s2153_s1 + $0x30] sm:$0xff]  ;;  %v1679_v8 = vld [vmem:[%s2153_s1 + $0x28] sm:$0xff]  ;;  %s2158_s17 = smov (!%p192_p3, %s1250_s17), 15  ;;  %vm1180_vm0 = vcmask 519168  }
   0xc   : > { %v1689_v1 = vld [vmem:[%s2153_s1 + $0x78] sm:$0xff]  ;;  %908 = vmatpush.bf16.msra.mxu0 %v1681_v0  ;;  %v1688_v5 = vld [vmem:[%s2153_s1 + $0x70] sm:$0xff]  ;;  %v1687_v9 = vld [vmem:[%s2153_s1 + $0x68] sm:$0xff]  ;;  %s1641_s18 = sshll.u32 %s2158_s17, 5  ;;  %s1254_s9 = sshll.u32 %s2158_s17, 2 }
   0xd   : > { %v1697_v2 = vld [vmem:[%s2153_s1 + $0xb8] sm:$0xff]  ;;  %937 = vmatpush.bf16.msra.mxu1 %v1689_v1  ;;  %v1696_v6 = vld [vmem:[%s2153_s1 + $0xb0] sm:$0xff]  ;;  %v1695_v10 = vld [vmem:[%s2153_s1 + $0xa8] sm:$0xff]  ;;  %s1873_s25 = scalar_lea.vmem %s2152_s0, %s1641_s18  ;;  %s2101_s12 = scalar_lea.vmem %s2156_s4, %s1254_s9 }
   0xe   : > { %v1705_v3 = vld [vmem:[%s2153_s1 + $0xf8] sm:$0xff]  ;;  %966 = vmatpush.bf16.msra.mxu2 %v1697_v2  ;;  %v1704_v7 = vld [vmem:[%s2153_s1 + $0xf0] sm:$0xff]  ;;  %v1703_v11 = vld [vmem:[%s2153_s1 + $0xe8] sm:$0xff] }
   0xf   : > { %995 = vmatpush.bf16.msra.mxu3 %v1705_v3  ;;  %v1678_v12 = vld [vmem:[%s2153_s1 + $0x20] sm:$0xff]  ;;  %v1677_v16 = vld [vmem:[%s2153_s1 + $0x18] sm:$0xff]  ;;  %v1676_v20 = vld [vmem:[%s2153_s1 + $0x10] sm:$0xff] }
  0x10   : > { %909 = vmatpush.bf16.msra.mxu0 %v1680_v4  ;;  %v1686_v13 = vld [vmem:[%s2153_s1 + $0x60] sm:$0xff]  ;;  %v1685_v17 = vld [vmem:[%s2153_s1 + $0x58] sm:$0xff]  ;;  %v1684_v21 = vld [vmem:[%s2153_s1 + $0x50] sm:$0xff] }
  0x11   : > { %938 = vmatpush.bf16.msra.mxu1 %v1688_v5  ;;  %v1694_v14 = vld [vmem:[%s2153_s1 + $0xa0] sm:$0xff]  ;;  %v1693_v18 = vld [vmem:[%s2153_s1 + $0x98] sm:$0xff]  ;;  %v1692_v22 = vld [vmem:[%s2153_s1 + $0x90] sm:$0xff] }
  0x12   : > { %967 = vmatpush.bf16.msra.mxu2 %v1696_v6  ;;  %v1702_v15 = vld [vmem:[%s2153_s1 + $0xe0] sm:$0xff]  ;;  %v1701_v19 = vld [vmem:[%s2153_s1 + $0xd8] sm:$0xff]  ;;  %v1700_v23 = vld [vmem:[%s2153_s1 + $0xd0] sm:$0xff] }
  0x13   : > { %996 = vmatpush.bf16.msra.mxu3 %v1704_v7  ;;  %v1675_v24 = vld [vmem:[%s2153_s1 + $0x8] sm:$0xff]  ;;  %v1674_v28 = vld [vmem:[%s2153_s1] sm:$0xff]  ;;  %v1729_v40 = vld [vmem:[%s2153_s1 + $0x1b8] sm:$0xff] }
  0x14   : > { %910 = vmatpush.bf16.msra.mxu0 %v1679_v8  ;;  %v1683_v25 = vld [vmem:[%s2153_s1 + $0x48] sm:$0xff]  ;;  %v1682_v29 = vld [vmem:[%s2153_s1 + $0x40] sm:$0xff]  ;;  %v1713_v41 = vld [vmem:[%s2153_s1 + $0x138] sm:$0xff] }
  0x15   : > { %939 = vmatpush.bf16.msra.mxu1 %v1687_v9  ;;  %v1691_v26 = vld [vmem:[%s2153_s1 + $0x88] sm:$0xff]  ;;  %v1690_v30 = vld [vmem:[%s2153_s1 + $0x80] sm:$0xff]  ;;  %v1737_v46 = vld [vmem:[%s2153_s1 + $0x1f8] sm:$0xff] }
  0x16   : > { %968 = vmatpush.bf16.msra.mxu2 %v1695_v10  ;;  %v1699_v27 = vld [vmem:[%s2153_s1 + $0xc8] sm:$0xff]  ;;  %v1698_v31 = vld [vmem:[%s2153_s1 + $0xc0] sm:$0xff]  ;;  %v1721_v47 = vld [vmem:[%s2153_s1 + $0x178] sm:$0xff] }
  0x17   : > { %997 = vmatpush.bf16.msra.mxu3 %v1703_v11  ;;  %v1257_v32 = vld [vmem:[%s1873_s25] sm:$0xf]  ;;  %v1642_v34 = vld [vmem:[%s1873_s25 + $0x4] sm:$0xf]  ;;  %v1265_v36 = vld [vmem:[%s1873_s25 + $0x8] sm:$0xf] }
  0x18   : > { %911 = vmatpush.bf16.msra.mxu0 %v1678_v12  ;;  %v1646_v33 = vld [vmem:[%s1873_s25 + $0x1c] sm:$0xf0]  ;;  %v1259_v35 = vld [vmem:[%s1873_s25 + $0x20] sm:$0xf0]  ;;  %v1647_v37 = vld [vmem:[%s1873_s25 + $0x24] sm:$0xf0] }
  0x19   : > { %940 = vmatpush.bf16.msra.mxu1 %v1686_v13  ;;  %v1643_v38 = vld [vmem:[%s1873_s25 + $0xc] sm:$0xf]  ;;  %v1258_v42 = vor.u32 %v1646_v33, %v1257_v32  ;;  %v1262_v43 = vor.u32 %v1642_v34, %v1259_v35  ;;  %v1266_v44 = vor.u32 %v1647_v37, %v1265_v36  ;;  %v1728_v48 = vld [vmem:[%s2153_s1 + $0x1b0] sm:$0xff]  ;;  %v1289_v56 = vld [vmem:[%s1873_s25 + $0x40] sm:$0xf] }
  0x1a   : > { %969 = vmatpush.bf16.msra.mxu2 %v1694_v14  ;;  %v1267_v39 = vld [vmem:[%s1873_s25 + $0x28] sm:$0xf0]  ;;  %v1712_v49 = vld [vmem:[%s2153_s1 + $0x130] sm:$0xff]  ;;  %v1726_v57 = vld [vmem:[%s2153_s1 + $0x1a0] sm:$0xff] }
  0x1b   : > { %998 = vmatpush.bf16.msra.mxu3 %v1702_v15  ;;  %v1270_v45 = vor.u32 %v1643_v38, %v1267_v39  ;;  %v1736_v50 = vld [vmem:[%s2153_s1 + $0x1f0] sm:$0xff]  ;;  %v1727_v52 = vld [vmem:[%s2153_s1 + $0x1a8] sm:$0xff]  ;;  %v1710_v58 = vld [vmem:[%s2153_s1 + $0x120] sm:$0xff] }
  0x1c   : > { %912 = vmatpush.bf16.msra.mxu0 %v1677_v16  ;;  %v1720_v51 = vld [vmem:[%s2153_s1 + $0x170] sm:$0xff]  ;;  %v1711_v53 = vld [vmem:[%s2153_s1 + $0x128] sm:$0xff]  ;;  %v1654_v59 = vld [vmem:[%s1873_s25 + $0x5c] sm:$0xf0] }
  0x1d   : > { %941 = vmatpush.bf16.msra.mxu1 %v1685_v17  ;;  %v1735_v54 = vld [vmem:[%s2153_s1 + $0x1e8] sm:$0xff]  ;;  %v1650_v60 = vld [vmem:[%s1873_s25 + $0x44] sm:$0xf]  ;;  %v1725_v4 = vld [vmem:[%s2153_s1 + $0x198] sm:$0xff]  ;;  %v1290_v6 = vor.u32 %v1654_v59, %v1289_v56 }
  0x1e   : > { %970 = vmatpush.bf16.msra.mxu2 %v1693_v18  ;;  %v1719_v55 = vld [vmem:[%s2153_s1 + $0x168] sm:$0xff]  ;;  %v1291_v61 = vld [vmem:[%s1873_s25 + $0x60] sm:$0xf0]  ;;  %v1709_v5 = vld [vmem:[%s2153_s1 + $0x118] sm:$0xff] }
  0x1f   : > { %999 = vmatpush.bf16.msra.mxu3 %v1701_v19  ;;  %v1297_v62 = vld [vmem:[%s1873_s25 + $0x48] sm:$0xf]  ;;  %v1651_v0 = vld [vmem:[%s1873_s25 + $0x4c] sm:$0xf]  ;;  %v1734_v2 = vld [vmem:[%s2153_s1 + $0x1e0] sm:$0xff]  ;;  %v1294_v7 = vor.u32 %v1650_v60, %v1291_v61 }
  0x20   : > { %913 = vmatpush.bf16.msra.mxu0 %v1676_v20  ;;  %v1655_v63 = vld [vmem:[%s1873_s25 + $0x64] sm:$0xf0]  ;;  %v1299_v1 = vld [vmem:[%s1873_s25 + $0x68] sm:$0xf0]  ;;  %v1718_v3 = vld [vmem:[%s2153_s1 + $0x160] sm:$0xff] }
  0x21   : > { %942 = vmatpush.bf16.msra.mxu1 %v1684_v21  ;;  %v1298_v8 = vor.u32 %v1655_v63, %v1297_v62  ;;  %v1302_v9 = vor.u32 %v1651_v0, %v1299_v1  ;;  %v1733_v10 = vld [vmem:[%s2153_s1 + $0x1d8] sm:$0xff]  ;;  %v1724_v12 = vld [vmem:[%s2153_s1 + $0x190] sm:$0xff]  ;;  %v1723_v16 = vld [vmem:[%s2153_s1 + $0x188] sm:$0xff] }
  0x22   : > { %971 = vmatpush.bf16.msra.mxu2 %v1692_v22  ;;  %v1717_v11 = vld [vmem:[%s2153_s1 + $0x158] sm:$0xff]  ;;  %v1708_v13 = vld [vmem:[%s2153_s1 + $0x110] sm:$0xff]  ;;  %v1707_v17 = vld [vmem:[%s2153_s1 + $0x108] sm:$0xff] }
  0x23   : > { %1000 = vmatpush.bf16.msra.mxu3 %v1700_v23  ;;  %v1732_v14 = vld [vmem:[%s2153_s1 + $0x1d0] sm:$0xff]  ;;  %v1731_v18 = vld [vmem:[%s2153_s1 + $0x1c8] sm:$0xff]  ;;  %v1321_v20 = vld [vmem:[%s1873_s25 + $0x80] sm:$0xf] }
  0x24   : > { %914 = vmatpush.bf16.msra.mxu0 %v1675_v24  ;;  %v1716_v15 = vld [vmem:[%s2153_s1 + $0x150] sm:$0xff]  ;;  %v1715_v19 = vld [vmem:[%s2153_s1 + $0x148] sm:$0xff]  ;;  %v1722_v21 = vld [vmem:[%s2153_s1 + $0x180] sm:$0xff] }
  0x25   : > { %943 = vmatpush.bf16.msra.mxu1 %v1683_v25  ;;  %v1706_v22 = vld [vmem:[%s2153_s1 + $0x100] sm:$0xff]  ;;  %v1305_v60 = vld [vmem:[%s1873_s25 + $0x50] sm:$0xf]  ;;  %v1652_v62 = vld [vmem:[%s1873_s25 + $0x54] sm:$0xf] }
  0x26   : > { %972 = vmatpush.bf16.msra.mxu2 %v1691_v26  ;;  %v1662_v23 = vld [vmem:[%s1873_s25 + $0x9c] sm:$0xf0]  ;;  %v1658_v24 = vld [vmem:[%s1873_s25 + $0x84] sm:$0xf]  ;;  %v1329_v26 = vld [vmem:[%s1873_s25 + $0x88] sm:$0xf] }
  0x27   : > { %1001 = vmatpush.bf16.msra.mxu3 %v1699_v27  ;;  %v1323_v25 = vld [vmem:[%s1873_s25 + $0xa0] sm:$0xf0]  ;;  %v1663_v27 = vld [vmem:[%s1873_s25 + $0xa4] sm:$0xf0]  ;;  %v1322_v32 = vor.u32 %v1662_v23, %v1321_v20  ;;  %v1353_v36 = vld [vmem:[%s1873_s25 + $0xc0] sm:$0xf] }
  0x28   : > { %915 = vmatpush.bf16.msra.mxu0 %v1674_v28  ;;  %v1659_v28 = vld [vmem:[%s1873_s25 + $0x8c] sm:$0xf]  ;;  %v1326_v33 = vor.u32 %v1658_v24, %v1323_v25  ;;  %v1330_v34 = vor.u32 %v1663_v27, %v1329_v26  ;;  %v1670_v37 = vld [vmem:[%s1873_s25 + $0xdc] sm:$0xf0]  ;;  %v1666_v38 = vld [vmem:[%s1873_s25 + $0xc4] sm:$0xf] }
  0x29   : > { %944 = vmatpush.bf16.msra.mxu1 %v1682_v29  ;;  %v1331_v29 = vld [vmem:[%s1873_s25 + $0xa8] sm:$0xf0]  ;;  %v1355_v39 = vld [vmem:[%s1873_s25 + $0xe0] sm:$0xf0]  ;;  %v1656_v61 = vld [vmem:[%s1873_s25 + $0x6c] sm:$0xf0] }
  0x2a   : > { %973 = vmatpush.bf16.msra.mxu2 %v1690_v30  ;;  %v1730_v30 = vld [vmem:[%s2153_s1 + $0x1c0] sm:$0xff]  ;;  %v1334_v35 = vor.u32 %v1659_v28, %v1331_v29  ;;  %v1307_v63 = vld [vmem:[%s1873_s25 + $0x70] sm:$0xf0]  ;;  %v1313_v0 = vld [vmem:[%s1873_s25 + $0x58] sm:$0xf] }
  0x2b   : > { %1002 = vmatpush.bf16.msra.mxu3 %v1698_v31  ;;  %916 = vmatmul.bf16.vlgmr.msra.gmra.mxu0 %v1258_v42  ;;  %v1714_v31 = vld [vmem:[%s2153_s1 + $0x140] sm:$0xff]  ;;  %v1667_v42 = vld [vmem:[%s1873_s25 + $0xcc] sm:$0xf]  ;;  %v1657_v1 = vld [vmem:[%s1873_s25 + $0x74] sm:$0xf0] }
  0x2c   : > { %1024 = vmatpush.bf16.msrb.mxu0 %v1713_v41  ;;  %945 = vmatmul.bf16.vlgmr.msra.gmra.mxu1 %v1262_v43  ;;  %v1671_v41 = vld [vmem:[%s1873_s25 + $0xe4] sm:$0xf0]  ;;  %v1363_v43 = vld [vmem:[%s1873_s25 + $0xe8] sm:$0xf0]  ;;  %v1369_v20 = vld [vmem:[%s1873_s25 + $0xd0] sm:$0xf] }
  0x2d   : > { %974 = vmatmul.bf16.vlgmr.msra.gmra.mxu2 %v1266_v44  ;;  %1053 = vmatpush.bf16.msrb.mxu1 %v1721_v47  ;;  %v1354_v44 = vor.u32 %v1670_v37, %v1353_v36  ;;  %v1366_v47 = vor.u32 %v1667_v42, %v1363_v43  ;;  %v1371_v23 = vld [vmem:[%s1873_s25 + $0xf0] sm:$0xf0]  ;;  %v1377_v24 = vld [vmem:[%s1873_s25 + $0xd8] sm:$0xf]  ;;  %v1669_v26 = vld [vmem:[%s1873_s25 + $0xdc] sm:$0xf] }
  0x2e   : > { %1082 = vmatpush.bf16.msrb.mxu2 %v1729_v40  ;;  %1003 = vmatmul.bf16.vlgmr.msra.gmra.mxu3 %v1270_v45  ;;  %v1361_v40 = vld [vmem:[%s1873_s25 + $0xc8] sm:$0xf]  ;;  %v1358_v45 = vor.u32 %v1666_v38, %v1355_v39  ;;  %v1673_v25 = vld [vmem:[%s1873_s25 + $0xf4] sm:$0xf0]  ;;  %v1379_v27 = vld [vmem:[%s1873_s25 + $0xf8] sm:$0xf0] }
  0x2f   : > { %1111 = vmatpush.bf16.msrb.mxu3 %v1737_v46  ;;  %v1362_v46 = vor.u32 %v1671_v41, %v1361_v40 }
  0x30   : > { %1025 = vmatpush.bf16.msrb.mxu0 %v1712_v49  ;;  %v1648_v49 = vld [vmem:[%s1873_s25 + $0x2c] sm:$0xf0] }
  0x31   : > { %1054 = vmatpush.bf16.msrb.mxu1 %v1720_v51  ;;  %v1275_v51 = vld [vmem:[%s1873_s25 + $0x30] sm:$0xf0] }
  0x32   : > { %1083 = vmatpush.bf16.msrb.mxu2 %v1728_v48  ;;  %v1273_v48 = vld [vmem:[%s1873_s25 + $0x10] sm:$0xf] }
  0x33   : > { %1112 = vmatpush.bf16.msrb.mxu3 %v1736_v50  ;;  %v1644_v50 = vld [vmem:[%s1873_s25 + $0x14] sm:$0xf]  ;;  %v1274_v56 = vor.u32 %v1648_v49, %v1273_v48 }
  0x34   : > { %1026 = vmatpush.bf16.msrb.mxu0 %v1711_v53  ;;  %v1649_v53 = vld [vmem:[%s1873_s25 + $0x34] sm:$0xf0] }
  0x35   : > { %1055 = vmatpush.bf16.msrb.mxu1 %v1719_v55  ;;  %v1283_v55 = vld [vmem:[%s1873_s25 + $0x38] sm:$0xf0] }
  0x36   : > { %1084 = vmatpush.bf16.msrb.mxu2 %v1727_v52  ;;  %v1281_v52 = vld [vmem:[%s1873_s25 + $0x18] sm:$0xf] }
  0x37   : > { %1113 = vmatpush.bf16.msrb.mxu3 %v1735_v54  ;;  %v1645_v54 = vld [vmem:[%s1873_s25 + $0x1c] sm:$0xf] }
  0x38   : > { %1027 = vmatpush.bf16.msrb.mxu0 %v1710_v58  ;;  %v1282_v58 = vor.u32 %v1649_v53, %v1281_v52  ;;  %v1286_v59 = vor.u32 %v1645_v54, %v1283_v55 }
  0x39   : > { %1056 = vmatpush.bf16.msrb.mxu1 %v1718_v3  ;;  %v1315_v3 = vld [vmem:[%s1873_s25 + $0x78] sm:$0xf0] }
  0x3a   : > { %1085 = vmatpush.bf16.msrb.mxu2 %v1726_v57  ;;  %v1278_v57 = vor.u32 %v1644_v50, %v1275_v51 }
  0x3b   : > { %1114 = vmatpush.bf16.msrb.mxu3 %v1734_v2  ;;  %921 = vmatmul.bf16.gmra.mxu0 %v1290_v6  ;;  %v1653_v2 = vld [vmem:[%s1873_s25 + $0x5c] sm:$0xf]  ;;  %v1314_v6 = vor.u32 %v1657_v1, %v1313_v0 }
  0x3c   : > { %1028 = vmatpush.bf16.msrb.mxu0 %v1709_v5  ;;  %950 = vmatmul.bf16.gmra.mxu1 %v1294_v7  ;;  %v1310_v5 = vor.u32 %v1652_v62, %v1307_v63  ;;  %v1318_v7 = vor.u32 %v1653_v2, %v1315_v3 }
  0x3d   : > { %979 = vmatmul.bf16.gmra.mxu2 %v1298_v8  ;;  %1057 = vmatpush.bf16.msrb.mxu1 %v1717_v11  ;;  %v1337_v8 = vld [vmem:[%s1873_s25 + $0x90] sm:$0xf]  ;;  %v1339_v11 = vld [vmem:[%s1873_s25 + $0xb0] sm:$0xf0] }
  0x3e   : > { %1086 = vmatpush.bf16.msrb.mxu2 %v1725_v4  ;;  %1008 = vmatmul.bf16.gmra.mxu3 %v1302_v9  ;;  %v1306_v4 = vor.u32 %v1656_v61, %v1305_v60  ;;  %v1664_v9 = vld [vmem:[%s1873_s25 + $0xac] sm:$0xf0] }
  0x3f   : > { %1115 = vmatpush.bf16.msrb.mxu3 %v1733_v10  ;;  %v1660_v10 = vld [vmem:[%s1873_s25 + $0x94] sm:$0xf] }
  0x40   : > { %1029 = vmatpush.bf16.msrb.mxu0 %v1708_v13  ;;  %v1665_v13 = vld [vmem:[%s1873_s25 + $0xb4] sm:$0xf0] }
  0x41   : > { %1058 = vmatpush.bf16.msrb.mxu1 %v1716_v15  ;;  %v1347_v15 = vld [vmem:[%s1873_s25 + $0xb8] sm:$0xf0] }
  0x42   : > { %1087 = vmatpush.bf16.msrb.mxu2 %v1724_v12  ;;  %v1345_v12 = vld [vmem:[%s1873_s25 + $0x98] sm:$0xf] }
  0x43   : > { %1116 = vmatpush.bf16.msrb.mxu3 %v1732_v14  ;;  %v1661_v14 = vld [vmem:[%s1873_s25 + $0x9c] sm:$0xf] }
  0x44   : > { %1030 = vmatpush.bf16.msrb.mxu0 %v1707_v17  ;;  %v1342_v17 = vor.u32 %v1660_v10, %v1339_v11 }
  0x45   : > { %1059 = vmatpush.bf16.msrb.mxu1 %v1715_v19  ;;  %v1350_v19 = vor.u32 %v1661_v14, %v1347_v15 }
  0x46   : > { %1088 = vmatpush.bf16.msrb.mxu2 %v1723_v16  ;;  %v1338_v16 = vor.u32 %v1664_v9, %v1337_v8 }
  0x47   : > { %1117 = vmatpush.bf16.msrb.mxu3 %v1731_v18  ;;  %v1346_v18 = vor.u32 %v1665_v13, %v1345_v12  ;;  %v2088_v13 = vld [vmem:[%s2154_s2] ss:$0 sm:$0xff] }
  0x48   : > { %1031 = vmatpush.bf16.msrb.mxu0 %v1706_v22  ;;  %v1668_v22 = vld [vmem:[%s1873_s25 + $0xd4] sm:$0xf] }
  0x49   : > { %1060 = vmatpush.bf16.msrb.mxu1 %v1714_v31  ;;  %v1374_v29 = vor.u32 %v1668_v22, %v1371_v23  ;;  %v1382_v31 = vor.u32 %v1669_v26, %v1379_v27 }
  0x4a   : > { %1089 = vmatpush.bf16.msrb.mxu2 %v1722_v21  ;;  %v1672_v21 = vld [vmem:[%s1873_s25 + $0xec] sm:$0xf0] }
  0x4b   : > { %1118 = vmatpush.bf16.msrb.mxu3 %v1730_v30  ;;  %926 = vmatmul.bf16.gmra.mxu0 %v1322_v32  ;;  %v1370_v28 = vor.u32 %v1672_v21, %v1369_v20  ;;  %v1378_v30 = vor.u32 %v1673_v25, %v1377_v24 }
  0x4c   : > { %955 = vmatmul.bf16.gmra.mxu1 %v1326_v33 }
  0x4d   : > { %984 = vmatmul.bf16.gmra.mxu2 %v1330_v34 }
  0x4e   : > { %1013 = vmatmul.bf16.gmra.mxu3 %v1334_v35 }
  0x5b   : > { %931 = vmatmul.bf16.gmra.mxu0 %v1354_v44 }
  0x5c   : > { %960 = vmatmul.bf16.gmra.mxu1 %v1358_v45 }
  0x5d   : > { %989 = vmatmul.bf16.gmra.mxu2 %v1362_v46 }
  0x5e   : > { %1018 = vmatmul.bf16.gmra.mxu3 %v1366_v47 }
  0x6b   : > { %1032 = vmatmul.bf16.vlgmr.msrb.gmra.mxu0 %v1274_v56 }
  0x6c   : > { %1061 = vmatmul.bf16.vlgmr.msrb.gmra.mxu1 %v1278_v57 }
  0x6d   : > { %1090 = vmatmul.bf16.vlgmr.msrb.gmra.mxu2 %v1282_v58 }
  0x6e   : > { %1119 = vmatmul.bf16.vlgmr.msrb.gmra.mxu3 %v1286_v59 }
  0x7b   : > { %1037 = vmatmul.bf16.gmra.mxu0 %v1306_v4 }
  0x7c   : > { %1066 = vmatmul.bf16.gmra.mxu1 %v1310_v5 }
  0x7d   : > { %1095 = vmatmul.bf16.gmra.mxu2 %v1314_v6 }
  0x7e   : > { %1124 = vmatmul.bf16.gmra.mxu3 %v1318_v7 }
  0x8b   : > { %1042 = vmatmul.bf16.gmra.mxu0 %v1338_v16 }
  0x8c   : > { %1071 = vmatmul.bf16.gmra.mxu1 %v1342_v17 }
  0x8d   : > { %1100 = vmatmul.bf16.gmra.mxu2 %v1346_v18  ;;  %v2093_v18 = vld [vmem:[%s2155_s3] ss:$0 sm:$0xff] }
  0x8e   : > { %1129 = vmatmul.bf16.gmra.mxu3 %v1350_v19 }
  0x9b   : > { %1047 = vmatmul.bf16.gmra.mxu0 %v1370_v28 }
  0x9c   : > { %1076 = vmatmul.bf16.gmra.mxu1 %v1374_v29 }
  0x9d   : > { %1105 = vmatmul.bf16.gmra.mxu2 %v1378_v30 }
  0x9e   : > { %1134 = vmatmul.bf16.gmra.mxu3 %v1382_v31 }
  0xa8   : > { %v917_v32 = vpop.f32.mrf.mxu0 }
  0xa9   : > { %v946_v33 = vpop.f32.mrf.mxu1 }
  0xaa   : > { %v947_v62 = vadd.f32 %v946_v33, %v917_v32 }
  0xb0   : > { %v975_v34 = vpop.f32.mrf.mxu2  ;;  %v919_v36 = vpop.f32.mrf.mxu0 }
  0xb1   : > { %v1004_v35 = vpop.f32.mrf.mxu3  ;;  %v948_v37 = vpop.f32.mrf.mxu1  ;;  %v976_v63 = vadd.f32 %v975_v34, %v947_v62 }
  0xb2   : > { %v949_v5 = vadd.f32 %v948_v37, %v919_v36 }
  0xb3   : > { %v1005_v2 = vadd.f32 %v1004_v35, %v976_v63 }
  0xb8   : > { %v977_v38 = vpop.f32.mrf.mxu2  ;;  %v922_v40 = vpop.f32.mrf.mxu0 }
  0xb9   : > { %v1006_v39 = vpop.f32.mrf.mxu3  ;;  %v951_v41 = vpop.f32.mrf.mxu1  ;;  %v978_v7 = vadd.f32 %v977_v38, %v949_v5 }
  0xba   : > { %v952_v16 = vadd.f32 %v951_v41, %v922_v40 }
  0xbb   : > { %v1007_v11 = vadd.f32 %v1006_v39, %v978_v7 }
  0xc0   : > { %v980_v42 = vpop.f32.mrf.mxu2  ;;  %v924_v44 = vpop.f32.mrf.mxu0 }
  0xc1   : > { %v1009_v43 = vpop.f32.mrf.mxu3  ;;  %v953_v45 = vpop.f32.mrf.mxu1  ;;  %v981_v20 = vadd.f32 %v980_v42, %v952_v16 }
  0xc2   : > { %v954_v31 = vadd.f32 %v953_v45, %v924_v44 }
  0xc3   : > { %v1010_v26 = vadd.f32 %v1009_v43, %v981_v20 }
  0xc8   : > { %v982_v46 = vpop.f32.mrf.mxu2  ;;  %v2053_v48 = vpop.f32.mrf.mxu0 }
  0xc9   : > { %v1011_v47 = vpop.f32.mrf.mxu3  ;;  %v2055_v49 = vpop.f32.mrf.mxu1  ;;  %v983_v35 = vadd.f32 %v982_v46, %v954_v31 }
  0xca   : > { %v957_v44 = vadd.f32 %v2055_v49, %v2053_v48 }
  0xcb   : > { %v1012_v41 = vadd.f32 %v1011_v47, %v983_v35 }
  0xd0   : > { %v2057_v50 = vpop.f32.mrf.mxu2  ;;  %v2061_v52 = vpop.f32.mrf.mxu0 }
  0xd1   : > { %v2059_v51 = vpop.f32.mrf.mxu3  ;;  %v2063_v53 = vpop.f32.mrf.mxu1 }
  0xd8   : > { %v2065_v54 = vpop.f32.mrf.mxu2  ;;  %v2069_v56 = vpop.f32.mrf.mxu0 }
  0xd9   : > { %v2067_v55 = vpop.f32.mrf.mxu3  ;;  %v2071_v57 = vpop.f32.mrf.mxu1 }
  0xe0   : > { %v2073_v58 = vpop.f32.mrf.mxu2  ;;  %v2077_v60 = vpop.f32.mrf.mxu0 }
  0xe1   : > { %v2075_v59 = vpop.f32.mrf.mxu3  ;;  %v2079_v61 = vpop.f32.mrf.mxu1 }
  0xe8   : > { %v2081_v0 = vpop.f32.mrf.mxu2  ;;  %v1033_v3 = vpop.f32.mrf.mxu0 }
  0xe9   : > { %v2083_v1 = vpop.f32.mrf.mxu3  ;;  %v1062_v4 = vpop.f32.mrf.mxu1  ;;  %v1034_v6 = vadd.f32 %v1033_v3, %v1005_v2  ;;  %v986_v3 = vadd.f32 %v2057_v50, %v957_v44 }
  0xeb   : > { %v1063_v8 = vadd.f32 %v1062_v4, %v1034_v6 }
  0xf0   : > { %v1091_v9 = vpop.f32.mrf.mxu2  ;;  %v1035_v14 = vpop.f32.mrf.mxu0 }
  0xf1   : > { %v1120_v10 = vpop.f32.mrf.mxu3  ;;  %v1092_v12 = vadd.f32 %v1091_v9, %v1063_v8  ;;  %v1064_v15 = vpop.f32.mrf.mxu1  ;;  %v1036_v19 = vadd.f32 %v1035_v14, %v1007_v11  ;;  %v1015_v8 = vadd.f32 %v2059_v51, %v986_v3  ;;  %v959_v11 = vadd.f32 %v2063_v53, %v2061_v52 }
  0xf3   : > { %v1121_v17 = vadd.f32 %v1120_v10, %v1092_v12  ;;  %v1065_v23 = vadd.f32 %v1064_v15, %v1036_v19  ;;  %v988_v15 = vadd.f32 %v2065_v54, %v959_v11 }
  0xf5   : > { %v1144_v21 = vmul.f32 %v2088_v13, %v1121_v17 }
  0xf7   : > { %v1156_v22 = vadd.f32 %v2093_v18, %v1144_v21  ;;  %v1017_v21 = vadd.f32 %v2067_v55, %v988_v15 }
  0xf8   : > { %v1093_v24 = vpop.f32.mrf.mxu2  ;;  %v1038_v29 = vpop.f32.mrf.mxu0 }
  0xf9   : > { %v1122_v25 = vpop.f32.mrf.mxu3  ;;  %v1164_v27 = vmax.f32 %v1156_v22, 0.0  ;;  %v1094_v28 = vadd.f32 %v1093_v24, %v1065_v23  ;;  %v1067_v30 = vpop.f32.mrf.mxu1  ;;  %v1039_v34 = vadd.f32 %v1038_v29, %v1010_v26  ;;  %v962_v24 = vadd.f32 %v2071_v57, %v2069_v56 }
  0xfa   : > { %v964_v57 = vadd.f32 %v2079_v61, %v2077_v60 }
  0xfb   : > { %v1172_v32 = vpack.c.bf16 %v1164_v27, %v1164_v27  ;;  %v1123_v33 = vadd.f32 %v1122_v25, %v1094_v28  ;;  %v1068_v38 = vadd.f32 %v1067_v30, %v1039_v34  ;;  %v991_v27 = vadd.f32 %v2073_v58, %v962_v24 }
  0xfd   : > { %1181 = vst.msk [vmem:[%s2101_s12] sm:$0xf] %vm1180_vm0, %v1172_v32  ;;  %v1145_v36 = vmul.f32 %v2088_v13, %v1123_v33  ;;  %v1020_v32 = vadd.f32 %v2075_v59, %v991_v27 }
  0xff   : > { %v1157_v37 = vadd.f32 %v2093_v18, %v1145_v36 }
 0x100   : > { %v1096_v39 = vpop.f32.mrf.mxu2  ;;  %v1040_v62 = vpop.f32.mrf.mxu0 }
 0x101   : > { %v1125_v40 = vpop.f32.mrf.mxu3  ;;  %v1165_v42 = vmax.f32 %v1157_v37, 0.0  ;;  %v1097_v43 = vadd.f32 %v1096_v39, %v1068_v38  ;;  %v1069_v63 = vpop.f32.mrf.mxu1  ;;  %v1041_v2 = vadd.f32 %v1040_v62, %v1012_v41  ;;  %v993_v38 = vadd.f32 %v2081_v0, %v964_v57 }
 0x103   : > { %v1173_v45 = vpack.c.bf16 %v1165_v42, %v1165_v42  ;;  %v1126_v46 = vadd.f32 %v1125_v40, %v1097_v43  ;;  %v1070_v47 = vadd.f32 %v1069_v63, %v1041_v2  ;;  %v1022_v43 = vadd.f32 %v2083_v1, %v993_v38 }
 0x105   : > { %1182 = vst.msk [vmem:[%s2101_s12 + $0x4] sm:$0xf] %vm1180_vm0, %v1173_v45  ;;  %v1146_v4 = vmul.f32 %v2088_v13, %v1126_v46 }
 0x107   : > { %v1158_v5 = vadd.f32 %v2093_v18, %v1146_v4 }
 0x108   : > { %v1098_v6 = vpop.f32.mrf.mxu2  ;;  %v1043_v48 = vpop.f32.mrf.mxu0 }
 0x109   : > { %v1127_v7 = vpop.f32.mrf.mxu3  ;;  %v1166_v9 = vmax.f32 %v1158_v5, 0.0  ;;  %v1099_v10 = vadd.f32 %v1098_v6, %v1070_v47  ;;  %v1072_v49 = vpop.f32.mrf.mxu1  ;;  %v1044_v14 = vadd.f32 %v1043_v48, %v1015_v8 }
 0x10b   : > { %v1174_v50 = vpack.c.bf16 %v1166_v9, %v1166_v9  ;;  %v1128_v12 = vadd.f32 %v1127_v7, %v1099_v10  ;;  %v1073_v51 = vadd.f32 %v1072_v49, %v1044_v14 }
 0x10d   : > { %1183 = vst.msk [vmem:[%s2101_s12 + $0x8] sm:$0xf] %vm1180_vm0, %v1174_v50  ;;  %v1147_v16 = vmul.f32 %v2088_v13, %v1128_v12 }
 0x10f   : > { %v1159_v17 = vadd.f32 %v2093_v18, %v1147_v16 }
 0x110   : > { %v1101_v19 = vpop.f32.mrf.mxu2  ;;  %v1045_v52 = vpop.f32.mrf.mxu0 }
 0x111   : > { %v1130_v20 = vpop.f32.mrf.mxu3  ;;  %v1167_v22 = vmax.f32 %v1159_v17, 0.0  ;;  %v1102_v23 = vadd.f32 %v1101_v19, %v1073_v51  ;;  %v1074_v53 = vpop.f32.mrf.mxu1  ;;  %v1046_v26 = vadd.f32 %v1045_v52, %v1017_v21 }
 0x113   : > { %v1175_v54 = vpack.c.bf16 %v1167_v22, %v1167_v22  ;;  %v1131_v25 = vadd.f32 %v1130_v20, %v1102_v23  ;;  %v1075_v55 = vadd.f32 %v1074_v53, %v1046_v26 }
 0x115   : > { %1184 = vst.msk [vmem:[%s2101_s12 + $0xc] sm:$0xf] %vm1180_vm0, %v1175_v54  ;;  %v1148_v28 = vmul.f32 %v2088_v13, %v1131_v25 }
 0x117   : > { %v1160_v29 = vadd.f32 %v2093_v18, %v1148_v28 }
 0x118   : > { %v1103_v30 = vpop.f32.mrf.mxu2  ;;  %v1048_v56 = vpop.f32.mrf.mxu0 }
 0x119   : > { %v1132_v31 = vpop.f32.mrf.mxu3  ;;  %v1168_v33 = vmax.f32 %v1160_v29, 0.0  ;;  %v1104_v34 = vadd.f32 %v1103_v30, %v1075_v55  ;;  %v1049_v36 = vadd.f32 %v1048_v56, %v1020_v32  ;;  %v1077_v37 = vpop.f32.mrf.mxu1 }
 0x11b   : > { %v1176_v35 = vpack.c.bf16 %v1168_v33, %v1168_v33  ;;  %v1133_v58 = vadd.f32 %v1132_v31, %v1104_v34  ;;  %v1078_v59 = vadd.f32 %v1077_v37, %v1049_v36 }
 0x11d   : > { %1185 = vst.msk [vmem:[%s2101_s12 + $0x10] sm:$0xf] %vm1180_vm0, %v1176_v35  ;;  %v1149_v39 = vmul.f32 %v2088_v13, %v1133_v58 }
 0x11f   : > { %v1161_v40 = vadd.f32 %v2093_v18, %v1149_v39 }
 0x120   : > { %v1106_v41 = vpop.f32.mrf.mxu2  ;;  %v1050_v61 = vpop.f32.mrf.mxu0 }
 0x121   : > { %v1135_v42 = vpop.f32.mrf.mxu3  ;;  %v1169_v62 = vmax.f32 %v1161_v40, 0.0  ;;  %v1107_v60 = vadd.f32 %v1106_v41, %v1078_v59  ;;  %v1051_v45 = vadd.f32 %v1050_v61, %v1022_v43  ;;  %v1079_v46 = vpop.f32.mrf.mxu1 }
 0x123   : > { %v1177_v63 = vpack.c.bf16 %v1169_v62, %v1169_v62  ;;  %v1136_v44 = vadd.f32 %v1135_v42, %v1107_v60  ;;  %v1080_v3 = vadd.f32 %v1079_v46, %v1051_v45 }
 0x125   : > { %1186 = vst.msk [vmem:[%s2101_s12 + $0x14] sm:$0xf] %vm1180_vm0, %v1177_v63  ;;  %v1150_v0 = vmul.f32 %v2088_v13, %v1136_v44 }
 0x127   : > { %v1162_v2 = vadd.f32 %v2093_v18, %v1150_v0 }
 0x128   : > { %v1108_v4 = vpop.f32.mrf.mxu2 }
 0x129   : > { %v1170_v5 = vmax.f32 %v1162_v2, 0.0  ;;  %v1109_v47 = vadd.f32 %v1108_v4, %v1080_v3  ;;  %v1137_v1 = vpop.f32.mrf.mxu3 }
 0x12b   : > { %v1178_v6 = vpack.c.bf16 %v1170_v5, %v1170_v5  ;;  %v1138_v7 = vadd.f32 %v1137_v1, %v1109_v47 }
 0x12d   : > { %1187 = vst.msk [vmem:[%s2101_s12 + $0x18] sm:$0xf] %vm1180_vm0, %v1178_v6  ;;  %v1151_v8 = vmul.f32 %v2088_v13, %v1138_v7 }
 0x12f   : > { %v1163_v9 = vadd.f32 %v2093_v18, %v1151_v8 }
 0x131   : > { %v1171_v10 = vmax.f32 %v1163_v9, 0.0 }
 0x133   : > { %v1179_v48 = vpack.c.bf16 %v1171_v10, %v1171_v10 }
 0x135   : > { %1188 = vst.msk [vmem:[%s2101_s12 + $0x1c] sm:$0xf] %vm1180_vm0, %v1179_v48 }
 0x136 PF: > { %s14_s15 = sadd.s32 1, %s1754_s15  }
 0x137   : > { %p11_p4 = scmp.ge.s32.totalorder %s14_s15, 4  }
 0x139   :  { %13 = sbr.rel (!%p11_p4) target bundleno = 1 (0x1), region = 66 }

// kernel: spatial_path_forward.7
= control target key start
LH: loop header
LB: loop body
LE: loop exit
PB: predicated region body
PF: predicated region fallthrough
CT: control target
= control target key end

     0   :  { %s418_s15 = smov 0   ;;  %s453_s0 = inlined_call_operand.vmem [shape: bf16[32,64], index: 0, kind: input, shape index: {}]   ;;  %s454_s1 = inlined_call_operand.vmem [shape: bf16[64,128], index: 1, kind: input, shape index: {}]   ;;  %s455_s2 = inlined_call_operand.vmem [shape: f32[1,128], index: 2, kind: input, shape index: {}]   ;;  %s456_s3 = inlined_call_operand.vmem [shape: f32[1,128], index: 3, kind: input, shape index: {}]   ;;  %s457_s4 = inlined_call_operand.vmem [shape: bf16[32,128], index: 4, kind: output, shape index: {}]  }
   0x1 LB: > { %s333_s16 = sadd.s32 4294967295, %s391_s15   ;;  %p337_p0 = scmp.ge.s32.totalorder %s391_s15, 1  ;;  %s391_s15 = sphi %s418_s15, %s14_s15  }
   0x2   : > { %p163_p1 = scmp.lt.s32.totalorder %s391_s15, 3 }
   0x4   : > { %p164_p2 = pnand %p337_p0, %p163_p1 }
   0x5   : > { %s338_s19 = sshll.u32 (!%p164_p2), %s333_s16, 1 }
   0x6   : > { %167 = sbr.rel (%p164_p2) target bundleno = 170 (0xaa), region = 36  ;;  %p190_p3 = scmp.lt.s32.totalorder (!%p164_p2), %s338_s19, 3 }
   0xb   : > { %v369_v0 = vld [vmem:[%s454_s1 + $0x18] sm:$0xff]  ;;  %v368_v1 = vld [vmem:[%s454_s1 + $0x10] sm:$0xff]  ;;  %s459_s19 = smov (!%p190_p3, %s338_s19), 3  ;;  %v367_v2 = vld [vmem:[%s454_s1 + $0x8] sm:$0xff]  ;;  %vm241_vm0 = vcmask 523264  }
   0xc   : > { %249 = vmatpush.bf16.msra.mxu0 %v369_v0  ;;  %s339_s24 = sshll.u32 %s459_s19, 2  ;;  %v366_v3 = vld [vmem:[%s454_s1] sm:$0xff] }
   0xd   : > { %s193_s29 = scalar_lea.vmem %s453_s0, %s339_s24  ;;  %v383_v6 = vld [vmem:[%s455_s2] ss:$0 sm:$0xff]  ;;  %s199_s10 = scalar_lea.vmem %s457_s4, %s339_s24 }
   0xe   : > { %v365_v4 = vld [vmem:[%s193_s29] sm:$0xff] }
   0xf   : > { %v384_v8 = vld [vmem:[%s456_s3] ss:$0 sm:$0xff] }
  0x10   : > { %250 = vmatpush.bf16.msra.mxu0 %v368_v1 }
  0x14   : > { %251 = vmatpush.bf16.msra.mxu0 %v367_v2 }
  0x18   : > { %252 = vmatpush.bf16.msra.mxu0 %v366_v3 }
  0x1b   : > { %362 = vmatmul.msk.bf16.vlgmr.msra.gmra.mxu0 %vm241_vm0, %v365_v4 }
  0x98   : > { %v254_v5 = vpop.f32.mrf.mxu0 }
  0x99   : > { %v263_v7 = vmul.f32 %v383_v6, %v254_v5 }
  0x9b   : > { %v269_v10 = vadd.f32 %v384_v8, %v263_v7 }
  0x9d   : > { %v271_v13 = vmax.f32 %v269_v10, 0.0 }
  0xa0   : > { %v256_v9 = vpop.f32.mrf.mxu0 }
  0xa1   : > { %v264_v11 = vmul.f32 %v383_v6, %v256_v9 }
  0xa3   : > { %v270_v12 = vadd.f32 %v384_v8, %v264_v11 }
  0xa5   : > { %v272_v14 = vmax.f32 %v270_v12, 0.0 }
  0xa7   : > { %v373_v15 = vpack.c.bf16 %v272_v14, %v271_v13 }
  0xa9   : > { %374 = vst [vmem:[%s199_s10] sm:$0xff] %v373_v15  }
  0xaa PF: > { %s14_s15 = sadd.s32 1, %s391_s15  }
  0xab   : > { %p11_p4 = scmp.ge.s32.totalorder %s14_s15, 4  }
  0xad   :  { %13 = sbr.rel (!%p11_p4) target bundleno = 1 (0x1), region = 66 }

// kernel: spatial_path_forward.6
= control target key start
LH: loop header
LB: loop body
LE: loop exit
PB: predicated region body
PF: predicated region fallthrough
CT: control target
= control target key end

     0   :  { %s1367_s15 = smov 0   ;;  %s1604_s0 = inlined_call_operand.vmem [shape: bf16[32,1024], index: 0, kind: input, shape index: {}]   ;;  %s1605_s1 = inlined_call_operand.vmem [shape: bf16[1024,64], index: 1, kind: input, shape index: {}]   ;;  %s1606_s2 = inlined_call_operand.vmem [shape: f32[1,64], index: 2, kind: input, shape index: {}]   ;;  %s1607_s3 = inlined_call_operand.vmem [shape: f32[1,64], index: 3, kind: input, shape index: {}]   ;;  %s1608_s4 = inlined_call_operand.vmem [shape: bf16[32,64], index: 4, kind: output, shape index: {}]  }
   0x1 LB: > { %s951_s16 = sadd.s32 4294967295, %s1340_s15   ;;  %p955_p0 = scmp.ge.s32.totalorder %s1340_s15, 1  ;;  %s1340_s15 = sphi %s1367_s15, %s14_s15  }
   0x2   : > { %p164_p1 = scmp.lt.s32.totalorder %s1340_s15, 3 }
   0x4   : > { %p165_p2 = pnand %p955_p0, %p164_p1 }
   0x5   : > { %s956_s17 = sshll.u32 (!%p165_p2), %s951_s16, 1 }
   0x6   : > { %168 = sbr.rel (%p165_p2) target bundleno = 230 (0xe6), region = 36  ;;  %p192_p3 = scmp.lt.s32.totalorder (!%p165_p2), %s956_s17, 3 }
   0xb   : > { %v1267_v0 = vld [vmem:[%s1605_s1 + $0x38] sm:$0xff]  ;;  %v1266_v4 = vld [vmem:[%s1605_s1 + $0x30] sm:$0xff]  ;;  %v1265_v8 = vld [vmem:[%s1605_s1 + $0x28] sm:$0xff]  ;;  %s1610_s17 = smov (!%p192_p3, %s956_s17), 3  ;;  %vm892_vm0 = vcmask 519168  }
   0xc   : > { %v1275_v1 = vld [vmem:[%s1605_s1 + $0x78] sm:$0xff]  ;;  %764 = vmatpush.bf16.msra.mxu0 %v1267_v0  ;;  %v1274_v5 = vld [vmem:[%s1605_s1 + $0x70] sm:$0xff]  ;;  %v1273_v9 = vld [vmem:[%s1605_s1 + $0x68] sm:$0xff]  ;;  %s1251_s18 = sshll.u32 %s1610_s17, 5  ;;  %s960_s9 = sshll.u32 %s1610_s17, 2 }
   0xd   : > { %v1283_v2 = vld [vmem:[%s1605_s1 + $0xb8] sm:$0xff]  ;;  %778 = vmatpush.bf16.msra.mxu1 %v1275_v1  ;;  %v1282_v6 = vld [vmem:[%s1605_s1 + $0xb0] sm:$0xff]  ;;  %v1281_v10 = vld [vmem:[%s1605_s1 + $0xa8] sm:$0xff]  ;;  %s1465_s28 = scalar_lea.vmem %s1604_s0, %s1251_s18  ;;  %s202_s12 = scalar_lea.vmem %s1608_s4, %s960_s9 }
   0xe   : > { %v1291_v3 = vld [vmem:[%s1605_s1 + $0xf8] sm:$0xff]  ;;  %792 = vmatpush.bf16.msra.mxu2 %v1283_v2  ;;  %v1290_v7 = vld [vmem:[%s1605_s1 + $0xf0] sm:$0xff]  ;;  %v1289_v11 = vld [vmem:[%s1605_s1 + $0xe8] sm:$0xff] }
   0xf   : > { %806 = vmatpush.bf16.msra.mxu3 %v1291_v3  ;;  %v1264_v12 = vld [vmem:[%s1605_s1 + $0x20] sm:$0xff]  ;;  %v1263_v16 = vld [vmem:[%s1605_s1 + $0x18] sm:$0xff]  ;;  %v1262_v20 = vld [vmem:[%s1605_s1 + $0x10] sm:$0xff] }
  0x10   : > { %765 = vmatpush.bf16.msra.mxu0 %v1266_v4  ;;  %v1272_v13 = vld [vmem:[%s1605_s1 + $0x60] sm:$0xff]  ;;  %v1271_v17 = vld [vmem:[%s1605_s1 + $0x58] sm:$0xff]  ;;  %v1270_v21 = vld [vmem:[%s1605_s1 + $0x50] sm:$0xff] }
  0x11   : > { %779 = vmatpush.bf16.msra.mxu1 %v1274_v5  ;;  %v1280_v14 = vld [vmem:[%s1605_s1 + $0xa0] sm:$0xff]  ;;  %v1279_v18 = vld [vmem:[%s1605_s1 + $0x98] sm:$0xff]  ;;  %v1278_v22 = vld [vmem:[%s1605_s1 + $0x90] sm:$0xff] }
  0x12   : > { %793 = vmatpush.bf16.msra.mxu2 %v1282_v6  ;;  %v1288_v15 = vld [vmem:[%s1605_s1 + $0xe0] sm:$0xff]  ;;  %v1287_v19 = vld [vmem:[%s1605_s1 + $0xd8] sm:$0xff]  ;;  %v1286_v23 = vld [vmem:[%s1605_s1 + $0xd0] sm:$0xff] }
  0x13   : > { %807 = vmatpush.bf16.msra.mxu3 %v1290_v7  ;;  %v1261_v24 = vld [vmem:[%s1605_s1 + $0x8] sm:$0xff]  ;;  %v1260_v28 = vld [vmem:[%s1605_s1] sm:$0xff]  ;;  %v1299_v32 = vld [vmem:[%s1605_s1 + $0x138] sm:$0xff] }
  0x14   : > { %766 = vmatpush.bf16.msra.mxu0 %v1265_v8  ;;  %v1269_v25 = vld [vmem:[%s1605_s1 + $0x48] sm:$0xff]  ;;  %v1268_v29 = vld [vmem:[%s1605_s1 + $0x40] sm:$0xff]  ;;  %v1307_v33 = vld [vmem:[%s1605_s1 + $0x178] sm:$0xff] }
  0x15   : > { %780 = vmatpush.bf16.msra.mxu1 %v1273_v9  ;;  %v1277_v26 = vld [vmem:[%s1605_s1 + $0x88] sm:$0xff]  ;;  %v1276_v30 = vld [vmem:[%s1605_s1 + $0x80] sm:$0xff]  ;;  %v1315_v42 = vld [vmem:[%s1605_s1 + $0x1b8] sm:$0xff] }
  0x16   : > { %794 = vmatpush.bf16.msra.mxu2 %v1281_v10  ;;  %v1285_v27 = vld [vmem:[%s1605_s1 + $0xc8] sm:$0xff]  ;;  %v1284_v31 = vld [vmem:[%s1605_s1 + $0xc0] sm:$0xff]  ;;  %v1323_v43 = vld [vmem:[%s1605_s1 + $0x1f8] sm:$0xff] }
  0x17   : > { %808 = vmatpush.bf16.msra.mxu3 %v1289_v11  ;;  %v971_v34 = vld [vmem:[%s1465_s28 + $0x8] sm:$0xf]  ;;  %v1253_v36 = vld [vmem:[%s1465_s28 + $0xc] sm:$0xf]  ;;  %v963_v38 = vld [vmem:[%s1465_s28] sm:$0xf] }
  0x18   : > { %767 = vmatpush.bf16.msra.mxu0 %v1264_v12  ;;  %v1257_v35 = vld [vmem:[%s1465_s28 + $0x24] sm:$0xf0]  ;;  %v973_v37 = vld [vmem:[%s1465_s28 + $0x28] sm:$0xf0]  ;;  %v1256_v39 = vld [vmem:[%s1465_s28 + $0x1c] sm:$0xf0] }
  0x19   : > { %781 = vmatpush.bf16.msra.mxu1 %v1272_v13  ;;  %v1252_v40 = vld [vmem:[%s1465_s28 + $0x4] sm:$0xf]  ;;  %v972_v44 = vor.u32 %v1257_v35, %v971_v34  ;;  %v976_v45 = vor.u32 %v1253_v36, %v973_v37  ;;  %v964_v46 = vor.u32 %v1256_v39, %v963_v38  ;;  %v1298_v48 = vld [vmem:[%s1605_s1 + $0x130] sm:$0xff]  ;;  %v1297_v52 = vld [vmem:[%s1605_s1 + $0x128] sm:$0xff] }
  0x1a   : > { %795 = vmatpush.bf16.msra.mxu2 %v1280_v14  ;;  %v965_v41 = vld [vmem:[%s1465_s28 + $0x20] sm:$0xf0]  ;;  %v1306_v49 = vld [vmem:[%s1605_s1 + $0x170] sm:$0xff]  ;;  %v1305_v53 = vld [vmem:[%s1605_s1 + $0x168] sm:$0xff] }
  0x1b   : > { %809 = vmatpush.bf16.msra.mxu3 %v1288_v15  ;;  %v968_v47 = vor.u32 %v1252_v40, %v965_v41  ;;  %v1314_v50 = vld [vmem:[%s1605_s1 + $0x1b0] sm:$0xff]  ;;  %v1313_v54 = vld [vmem:[%s1605_s1 + $0x1a8] sm:$0xff]  ;;  %v1296_v56 = vld [vmem:[%s1605_s1 + $0x120] sm:$0xff] }
  0x1c   : > { %768 = vmatpush.bf16.msra.mxu0 %v1263_v16  ;;  %v1322_v51 = vld [vmem:[%s1605_s1 + $0x1f0] sm:$0xff]  ;;  %v1321_v55 = vld [vmem:[%s1605_s1 + $0x1e8] sm:$0xff]  ;;  %v1304_v57 = vld [vmem:[%s1605_s1 + $0x160] sm:$0xff] }
  0x1d   : > { %782 = vmatpush.bf16.msra.mxu1 %v1271_v17  ;;  %v1312_v58 = vld [vmem:[%s1605_s1 + $0x1a0] sm:$0xff]  ;;  %v1295_v60 = vld [vmem:[%s1605_s1 + $0x118] sm:$0xff]  ;;  %v1294_v0 = vld [vmem:[%s1605_s1 + $0x110] sm:$0xff] }
  0x1e   : > { %796 = vmatpush.bf16.msra.mxu2 %v1279_v18  ;;  %v1320_v59 = vld [vmem:[%s1605_s1 + $0x1e0] sm:$0xff]  ;;  %v1303_v61 = vld [vmem:[%s1605_s1 + $0x158] sm:$0xff]  ;;  %v1302_v1 = vld [vmem:[%s1605_s1 + $0x150] sm:$0xff] }
  0x1f   : > { %810 = vmatpush.bf16.msra.mxu3 %v1287_v19  ;;  %v1311_v62 = vld [vmem:[%s1605_s1 + $0x198] sm:$0xff]  ;;  %v1310_v2 = vld [vmem:[%s1605_s1 + $0x190] sm:$0xff]  ;;  %v1293_v4 = vld [vmem:[%s1605_s1 + $0x108] sm:$0xff] }
  0x20   : > { %769 = vmatpush.bf16.msra.mxu0 %v1262_v20  ;;  %v1319_v63 = vld [vmem:[%s1605_s1 + $0x1d8] sm:$0xff]  ;;  %v1318_v3 = vld [vmem:[%s1605_s1 + $0x1d0] sm:$0xff]  ;;  %v1301_v5 = vld [vmem:[%s1605_s1 + $0x148] sm:$0xff] }
  0x21   : > { %783 = vmatpush.bf16.msra.mxu1 %v1270_v21  ;;  %v1309_v6 = vld [vmem:[%s1605_s1 + $0x188] sm:$0xff]  ;;  %v1292_v8 = vld [vmem:[%s1605_s1 + $0x100] sm:$0xff]  ;;  %v979_v12 = vld [vmem:[%s1465_s28 + $0x10] sm:$0xf] }
  0x22   : > { %797 = vmatpush.bf16.msra.mxu2 %v1278_v22  ;;  %v1317_v7 = vld [vmem:[%s1605_s1 + $0x1c8] sm:$0xff]  ;;  %v1300_v9 = vld [vmem:[%s1605_s1 + $0x140] sm:$0xff]  ;;  %v1258_v13 = vld [vmem:[%s1465_s28 + $0x2c] sm:$0xf0] }
  0x23   : > { %811 = vmatpush.bf16.msra.mxu3 %v1286_v23  ;;  %v1308_v10 = vld [vmem:[%s1605_s1 + $0x180] sm:$0xff]  ;;  %v1254_v14 = vld [vmem:[%s1465_s28 + $0x14] sm:$0xf]  ;;  %v987_v16 = vld [vmem:[%s1465_s28 + $0x18] sm:$0xf]  ;;  %v980_v20 = vor.u32 %v1258_v13, %v979_v12 }
  0x24   : > { %770 = vmatpush.bf16.msra.mxu0 %v1261_v24  ;;  %v1316_v11 = vld [vmem:[%s1605_s1 + $0x1c0] sm:$0xff]  ;;  %v981_v15 = vld [vmem:[%s1465_s28 + $0x30] sm:$0xf0]  ;;  %v1259_v17 = vld [vmem:[%s1465_s28 + $0x34] sm:$0xf0] }
  0x25   : > { %784 = vmatpush.bf16.msra.mxu1 %v1269_v25  ;;  %v1255_v18 = vld [vmem:[%s1465_s28 + $0x1c] sm:$0xf]  ;;  %v984_v21 = vor.u32 %v1254_v14, %v981_v15  ;;  %v988_v22 = vor.u32 %v1259_v17, %v987_v16 }
  0x26   : > { %798 = vmatpush.bf16.msra.mxu2 %v1277_v26  ;;  %v989_v19 = vld [vmem:[%s1465_s28 + $0x38] sm:$0xf0] }
  0x27   : > { %812 = vmatpush.bf16.msra.mxu3 %v1285_v27  ;;  %v992_v23 = vor.u32 %v1255_v18, %v989_v19 }
  0x28   : > { %771 = vmatpush.bf16.msra.mxu0 %v1260_v28 }
  0x29   : > { %785 = vmatpush.bf16.msra.mxu1 %v1268_v29 }
  0x2a   : > { %799 = vmatpush.bf16.msra.mxu2 %v1276_v30 }
  0x2b   : > { %813 = vmatpush.bf16.msra.mxu3 %v1284_v31  ;;  %772 = vmatmul.bf16.vlgmr.msra.gmra.mxu0 %v964_v46 }
  0x2c   : > { %820 = vmatpush.bf16.msrb.mxu0 %v1299_v32  ;;  %786 = vmatmul.bf16.vlgmr.msra.gmra.mxu1 %v968_v47 }
  0x2d   : > { %834 = vmatpush.bf16.msrb.mxu1 %v1307_v33  ;;  %800 = vmatmul.bf16.vlgmr.msra.gmra.mxu2 %v972_v44 }
  0x2e   : > { %848 = vmatpush.bf16.msrb.mxu2 %v1315_v42  ;;  %814 = vmatmul.bf16.vlgmr.msra.gmra.mxu3 %v976_v45  ;;  %v1332_v45 = vld [vmem:[%s1606_s2] ss:$0 sm:$0xff] }
  0x2f   : > { %862 = vmatpush.bf16.msrb.mxu3 %v1323_v43 }
  0x30   : > { %821 = vmatpush.bf16.msrb.mxu0 %v1298_v48  ;;  %v1333_v48 = vld [vmem:[%s1607_s3] ss:$0 sm:$0xff] }
  0x31   : > { %835 = vmatpush.bf16.msrb.mxu1 %v1306_v49 }
  0x32   : > { %849 = vmatpush.bf16.msrb.mxu2 %v1314_v50 }
  0x33   : > { %863 = vmatpush.bf16.msrb.mxu3 %v1322_v51 }
  0x34   : > { %822 = vmatpush.bf16.msrb.mxu0 %v1297_v52 }
  0x35   : > { %836 = vmatpush.bf16.msrb.mxu1 %v1305_v53 }
  0x36   : > { %850 = vmatpush.bf16.msrb.mxu2 %v1313_v54 }
  0x37   : > { %864 = vmatpush.bf16.msrb.mxu3 %v1321_v55 }
  0x38   : > { %823 = vmatpush.bf16.msrb.mxu0 %v1296_v56 }
  0x39   : > { %837 = vmatpush.bf16.msrb.mxu1 %v1304_v57 }
  0x3a   : > { %851 = vmatpush.bf16.msrb.mxu2 %v1312_v58 }
  0x3b   : > { %865 = vmatpush.bf16.msrb.mxu3 %v1320_v59 }
  0x3c   : > { %824 = vmatpush.bf16.msrb.mxu0 %v1295_v60 }
  0x3d   : > { %838 = vmatpush.bf16.msrb.mxu1 %v1303_v61 }
  0x3e   : > { %852 = vmatpush.bf16.msrb.mxu2 %v1311_v62 }
  0x3f   : > { %866 = vmatpush.bf16.msrb.mxu3 %v1319_v63 }
  0x40   : > { %825 = vmatpush.bf16.msrb.mxu0 %v1294_v0 }
  0x41   : > { %839 = vmatpush.bf16.msrb.mxu1 %v1302_v1 }
  0x42   : > { %853 = vmatpush.bf16.msrb.mxu2 %v1310_v2 }
  0x43   : > { %867 = vmatpush.bf16.msrb.mxu3 %v1318_v3 }
  0x44   : > { %826 = vmatpush.bf16.msrb.mxu0 %v1293_v4 }
  0x45   : > { %840 = vmatpush.bf16.msrb.mxu1 %v1301_v5 }
  0x46   : > { %854 = vmatpush.bf16.msrb.mxu2 %v1309_v6 }
  0x47   : > { %868 = vmatpush.bf16.msrb.mxu3 %v1317_v7 }
  0x48   : > { %827 = vmatpush.bf16.msrb.mxu0 %v1292_v8 }
  0x49   : > { %841 = vmatpush.bf16.msrb.mxu1 %v1300_v9 }
  0x4a   : > { %855 = vmatpush.bf16.msrb.mxu2 %v1308_v10 }
  0x4b   : > { %869 = vmatpush.bf16.msrb.mxu3 %v1316_v11  ;;  %828 = vmatmul.bf16.vlgmr.msrb.gmra.mxu0 %v980_v20 }
  0x4c   : > { %842 = vmatmul.bf16.vlgmr.msrb.gmra.mxu1 %v984_v21 }
  0x4d   : > { %856 = vmatmul.bf16.vlgmr.msrb.gmra.mxu2 %v988_v22 }
  0x4e   : > { %870 = vmatmul.bf16.vlgmr.msrb.gmra.mxu3 %v992_v23 }
  0xa8   : > { %v773_v24 = vpop.f32.mrf.mxu0 }
  0xa9   : > { %v787_v25 = vpop.f32.mrf.mxu1 }
  0xaa   : > { %v788_v28 = vadd.f32 %v787_v25, %v773_v24 }
  0xb0   : > { %v801_v26 = vpop.f32.mrf.mxu2  ;;  %v775_v29 = vpop.f32.mrf.mxu0 }
  0xb1   : > { %v815_v27 = vpop.f32.mrf.mxu3  ;;  %v789_v30 = vpop.f32.mrf.mxu1  ;;  %v802_v31 = vadd.f32 %v801_v26, %v788_v28 }
  0xb2   : > { %v790_v35 = vadd.f32 %v789_v30, %v775_v29 }
  0xb3   : > { %v816_v34 = vadd.f32 %v815_v27, %v802_v31 }
  0xb8   : > { %v803_v32 = vpop.f32.mrf.mxu2 }
  0xb9   : > { %v817_v33 = vpop.f32.mrf.mxu3  ;;  %v804_v39 = vadd.f32 %v803_v32, %v790_v35 }
  0xbb   : > { %v818_v43 = vadd.f32 %v817_v33, %v804_v39 }
  0xc8   : > { %v829_v36 = vpop.f32.mrf.mxu0 }
  0xc9   : > { %v830_v37 = vadd.f32 %v829_v36, %v816_v34  ;;  %v843_v38 = vpop.f32.mrf.mxu1 }
  0xcb   : > { %v844_v40 = vadd.f32 %v843_v38, %v830_v37 }
  0xd0   : > { %v857_v41 = vpop.f32.mrf.mxu2  ;;  %v831_v46 = vpop.f32.mrf.mxu0 }
  0xd1   : > { %v871_v42 = vpop.f32.mrf.mxu3  ;;  %v858_v44 = vadd.f32 %v857_v41, %v844_v40  ;;  %v832_v49 = vadd.f32 %v831_v46, %v818_v43  ;;  %v845_v51 = vpop.f32.mrf.mxu1 }
  0xd3   : > { %v872_v47 = vadd.f32 %v871_v42, %v858_v44  ;;  %v846_v53 = vadd.f32 %v845_v51, %v832_v49 }
  0xd5   : > { %v880_v50 = vmul.f32 %v1332_v45, %v872_v47 }
  0xd7   : > { %v886_v52 = vadd.f32 %v1333_v48, %v880_v50 }
  0xd8   : > { %v859_v54 = vpop.f32.mrf.mxu2 }
  0xd9   : > { %v888_v55 = vmax.f32 %v886_v52, 0.0  ;;  %v860_v56 = vadd.f32 %v859_v54, %v846_v53  ;;  %v873_v57 = vpop.f32.mrf.mxu3 }
  0xdb   : > { %v890_v58 = vpack.c.bf16 %v888_v55, %v888_v55  ;;  %v874_v59 = vadd.f32 %v873_v57, %v860_v56 }
  0xdd   : > { %893 = vst.msk [vmem:[%s202_s12] sm:$0xf] %vm892_vm0, %v890_v58  ;;  %v881_v60 = vmul.f32 %v1332_v45, %v874_v59 }
  0xdf   : > { %v887_v61 = vadd.f32 %v1333_v48, %v881_v60 }
  0xe1   : > { %v889_v62 = vmax.f32 %v887_v61, 0.0 }
  0xe3   : > { %v891_v63 = vpack.c.bf16 %v889_v62, %v889_v62 }
  0xe5   : > { %894 = vst.msk [vmem:[%s202_s12 + $0x4] sm:$0xf] %vm892_vm0, %v891_v63 }
  0xe6 PF: > { %s14_s15 = sadd.s32 1, %s1340_s15  }
  0xe7   : > { %p11_p4 = scmp.ge.s32.totalorder %s14_s15, 4  }
  0xe9   :  { %13 = sbr.rel (!%p11_p4) target bundleno = 1 (0x1), region = 66 }

</bundles_post_ra>
